<compile_context>
chip_gen: v6e
topology: v6e:2x2x1
jax: 0.10.0
libtpu: 0.0.40
codegen_flags: <defaults>
</compile_context>

<pallas_src>
import jax
import jax.numpy as jnp
import numpy as np
from jax import lax
from jax.experimental import pallas as pl
from jax.experimental.pallas import tpu as pltpu

EXPANSION = 4
BN_EPS = 1e-5


# ------------------------------ Pallas kernel ------------------------------

def _bottleneck_kernel(x_ref, w1_ref, w2_ref, w3_ref, b1_ref, b2_ref, b3_ref,
                       o_ref, a1_ref):
    """Fused Bottleneck for one whole image.

    x_ref  : (H, W, Cin)            activation (also the residual)
    w1_ref : (Cin, width)           conv1 weight, BN1 scale folded in
    w2_ref : (3, 3*width, width)    conv2 weight; row dh, K axis = dw-major
                                    [dw=0 chans | dw=1 chans | dw=2 chans]
    w3_ref : (width, out_ch)        conv3 weight, BN3 scale folded in
    b*_ref : (1, C) f32             folded BN biases
    o_ref  : (H, W, out_ch)         output
    a1_ref : (H+2, W, 3*width)      VMEM scratch: "wide" conv1 output with the
                                    3x3's zero padding materialised as
                                    permanently-zero rows / lane-block columns
    """
    H, W, cin = x_ref.shape
    width = w1_ref.shape[1]
    out_ch = w3_ref.shape[1]
    f32 = jnp.float32
    cdt = a1_ref.dtype          # storage/compute dtype for intermediates

    # ---- conv1 (1x1) + bn1 + relu : one MXU matmul over all H*W rows ----
    x2 = x_ref[...].reshape(H * W, cin)
    y1 = jnp.dot(x2, w1_ref[...], preferred_element_type=f32)
    y1 = jnp.maximum(y1 + b1_ref[...], 0.0).astype(cdt).reshape(H, W, width)

    # ---- build the wide conv1 activation (all shifting done HERE, once, on
    #      the narrow dtype): lane blocks = taps (w-1, w, w+1) ----
    zc = jnp.zeros((H, 1, width), cdt)
    left = jnp.concatenate([zc, y1[:, : W - 1, :]], axis=1)    # tap dw=0 (col w-1)
    right = jnp.concatenate([y1[:, 1:, :], zc], axis=1)        # tap dw=2 (col w+1)
    y1w = jnp.concatenate([left, y1, right], axis=-1)          # (H, W, 3*width)

    zr = jnp.zeros((W, 3 * width), cdt)
    a1_ref[0] = zr                 # conv2 zero padding, row above the image
    a1_ref[1:H + 1] = y1w
    a1_ref[H + 1] = zr             # conv2 zero padding, row below the image

    # ---- conv2 (3x3, stride 1, pad 1) as 3 fat matmuls (K = 3*width) over
    #      row-shifted slabs of the wide scratch + bn2 + relu ----
    acc = jnp.dot(a1_ref[0:H].reshape(H * W, 3 * width), w2_ref[0],
                  preferred_element_type=f32)
    for dh in (1, 2):
        acc = acc + jnp.dot(a1_ref[dh:dh + H].reshape(H * W, 3 * width),
                            w2_ref[dh], preferred_element_type=f32)
    y2 = jnp.maximum(acc + b2_ref[...], 0.0).astype(cdt)

    # ---- conv3 (1x1) + bn3 + residual add + relu (use_last_relu=True) ----
    y3 = jnp.dot(y2, w3_ref[...], preferred_element_type=f32) + b3_ref[...]
    # residual re-loaded from VMEM here (short live range across conv2)
    y3 = y3 + x_ref[...].reshape(H * W, cin).astype(f32)
    o_ref[...] = jnp.maximum(y3, 0.0).reshape(H, W, out_ch).astype(o_ref.dtype)


# ------------------------------- wrappers ----------------------------------

def bottleneck_forward_nhwc(x, fp):
    """Fused Pallas Bottleneck forward on NHWC activations (native fast path)."""
    w1, w2, w3 = fp["w1"], fp["w2"], fp["w3"]
    b1, b2, b3 = fp["b1"], fp["b2"], fp["b3"]
    cin, width = w1.shape
    out_ch = w3.shape[1]
    assert cin == out_ch, (
        "residual add requires inplanes == planes*expansion (downsample=None)")
    B, H, W, c = x.shape
    assert c == cin
    itemsize = jnp.dtype(x.dtype).itemsize

    grid = (B,)   # whole-image tiles; >=2 steps feeds both TCs on v7x for B>=2

    x_spec = pl.BlockSpec((None, H, W, cin), lambda b: (b, 0, 0, 0))
    out_spec = pl.BlockSpec((None, H, W, out_ch), lambda b: (b, 0, 0, 0))
    # constant block index -> fetched once, resident in VMEM across the grid
    w1_spec = pl.BlockSpec(w1.shape, lambda b: (0, 0))
    w2_spec = pl.BlockSpec(w2.shape, lambda b: (0, 0, 0))
    w3_spec = pl.BlockSpec(w3.shape, lambda b: (0, 0))
    b1_spec = pl.BlockSpec(b1.shape, lambda b: (0, 0))
    b2_spec = pl.BlockSpec(b2.shape, lambda b: (0, 0))
    b3_spec = pl.BlockSpec(b3.shape, lambda b: (0, 0))

    flops = 2 * B * H * W * (cin * width + 9 * width * width + width * out_ch)
    bytes_accessed = (B * H * W * (cin + out_ch) * itemsize
                      + (w1.size + w2.size + w3.size) * itemsize
                      + (b1.size + b2.size + b3.size) * 4)

    # Per-step VMEM estimate: double-buffered in/out tiles, weights (x2 for the
    # pipeline's buffers), the wide scratch and the f32 conv2 accumulator.
    vmem_est = (2 * H * W * (cin + out_ch) * itemsize
                + 2 * ((w1.size + w2.size + w3.size) * itemsize
                       + (b1.size + b2.size + b3.size) * 4)
                + (H + 2) * W * 3 * width * itemsize
                + H * W * (3 * width * itemsize + 4 * width + width * itemsize))
    cp_kwargs = {}
    if vmem_est > 12 * 1024 * 1024:
        # v7x: 64 MiB physical per TensorCore (32 MiB scoped default);
        # v5e/v6e: 128 MiB physical.  Cap at 64 MiB so one config runs on all.
        cp_kwargs["vmem_limit_bytes"] = int(min(2 * vmem_est, 64 * 1024 * 1024))

    return pl.pallas_call(
        _bottleneck_kernel,
        out_shape=jax.ShapeDtypeStruct((B, H, W, out_ch), x.dtype),
        grid=grid,
        in_specs=[x_spec, w1_spec, w2_spec, w3_spec, b1_spec, b2_spec, b3_spec],
        out_specs=out_spec,
        scratch_shapes=[pltpu.VMEM((H + 2, W, 3 * width), x.dtype)],
        compiler_params=pltpu.CompilerParams(
            dimension_semantics=("parallel",), **cp_kwargs),
        cost_estimate=pl.CostEstimate(flops=flops, transcendentals=0,
                                      bytes_accessed=bytes_accessed),
    )(x, w1, w2, w3, b1, b2, b3)


def bottleneck_forward(x_nchw, fp):
    """NCHW convenience wrapper (PyTorch layout).

    In a full network keep activations NHWC end-to-end and call
    bottleneck_forward_nhwc directly; the two transposes below are separate
    XLA ops that move the whole tensor through HBM twice.
    """
    x = jnp.transpose(x_nchw, (0, 2, 3, 1))
    out = bottleneck_forward_nhwc(x, fp)
    return jnp.transpose(out, (0, 3, 1, 2))


# --------------------------- params / BN folding ---------------------------

def _fold_bn(gamma, beta, mean, var, eps=BN_EPS):
    scale = gamma / jnp.sqrt(var + eps)
    bias = beta - mean * scale
    return scale, bias


def fold_bottleneck_params(params, dtype=jnp.float32):
    """Fold inference-mode BN into the conv weights once and lay them out for
    the channels-last / wide-K matmuls used by the kernel."""
    s1, b1 = _fold_bn(*params["bn1"])
    s2, b2 = _fold_bn(*params["bn2"])
    s3, b3 = _fold_bn(*params["bn3"])

    width = params["w2"].shape[0]
    w1 = params["w1"][:, :, 0, 0].T * s1[None, :]                  # (Cin, width)
    # (Cout, Cin, kh, kw) -> (kh, kw, Cin, Cout) -> (3, 3*width, width)
    # K axis order per row dh: [dw=0 channels | dw=1 channels | dw=2 channels]
    w2 = (jnp.transpose(params["w2"], (2, 3, 1, 0)) * s2[None, None, None, :]
          ).reshape(3, 3 * width, width)
    w3 = params["w3"][:, :, 0, 0].T * s3[None, :]                  # (width, out)

    return {
        "w1": w1.astype(dtype), "w2": w2.astype(dtype), "w3": w3.astype(dtype),
        "b1": b1.reshape(1, -1).astype(jnp.float32),
        "b2": b2.reshape(1, -1).astype(jnp.float32),
        "b3": b3.reshape(1, -1).astype(jnp.float32),
    }


def init_bottleneck_params(key, inplanes, planes, base_width=64, groups=1):
    width = int(planes * (base_width / 64.0)) * groups
    out_ch = planes * EXPANSION
    assert inplanes == out_ch, (
        "residual add requires inplanes == planes*expansion (downsample=None)")
    ks = jax.random.split(key, 15)

    def conv_w(k, cout, cin, kh, kw):
        fan_in = cin * kh * kw
        return jax.random.normal(k, (cout, cin, kh, kw), jnp.float32) / np.sqrt(fan_in)

    def bn_p(k0, k1, k2, k3, c):
        gamma = 1.0 + 0.1 * jax.random.normal(k0, (c,), jnp.float32)
        beta = 0.1 * jax.random.normal(k1, (c,), jnp.float32)
        mean = 0.1 * jax.random.normal(k2, (c,), jnp.float32)
        var = 0.5 + jnp.abs(jax.random.normal(k3, (c,), jnp.float32)) * 0.5
        return gamma, beta, mean, var

    return {
        "w1": conv_w(ks[0], width, inplanes, 1, 1),
        "w2": conv_w(ks[1], width, width, 3, 3),
        "w3": conv_w(ks[2], out_ch, width, 1, 1),
        "bn1": bn_p(ks[3], ks[4], ks[5], ks[6], width),     # width == planes here
        "bn2": bn_p(ks[7], ks[8], ks[9], ks[10], width),
        "bn3": bn_p(ks[11], ks[12], ks[13], ks[14], out_ch),
    }, width, out_ch


# --------------------------- pure-JAX reference ----------------------------

def bottleneck_reference(x_nchw, params):
    dn = ("NCHW", "OIHW", "NCHW")

    def bn_apply(y, bn):
        s, b = _fold_bn(*bn)
        return y * s[None, :, None, None] + b[None, :, None, None]

    out = lax.conv_general_dilated(x_nchw, params["w1"], (1, 1), "VALID",
                                   dimension_numbers=dn)
    out = jnp.maximum(bn_apply(out, params["bn1"]), 0.0)
    out = lax.conv_general_dilated(out, params["w2"], (1, 1), ((1, 1), (1, 1)),
                                   dimension_numbers=dn)
    out = jnp.maximum(bn_apply(out, params["bn2"]), 0.0)
    out = lax.conv_general_dilated(out, params["w3"], (1, 1), "VALID",
                                   dimension_numbers=dn)
    out = bn_apply(out, params["bn3"]) + x_nchw
    return jnp.maximum(out, 0.0)


# ---------------------------------- main -----------------------------------

if __name__ == "__main__":
    key = jax.random.PRNGKey(0)
    k_x, k_p = jax.random.split(key)

    inplanes, planes = 64, 16           # width = 16, output channels = 64
    B, H, W = 2, 16, 16
    x = jax.random.normal(k_x, (B, inplanes, H, W), jnp.float32)

    params, width, out_ch = init_bottleneck_params(k_p, inplanes, planes)
    y_ref = jax.block_until_ready(bottleneck_reference(x, params))

    # f32 activations / weights.
    fp32 = fold_bottleneck_params(params, jnp.float32)
    y = jax.block_until_ready(jax.jit(bottleneck_forward)(x, fp32))
    assert y.shape == (B, out_ch, H, W), y.shape
    np.testing.assert_allclose(np.asarray(y), np.asarray(y_ref),
                               atol=2e-3, rtol=2e-3)

    # bf16 activations / weights (f32 MXU accumulation, f32 folded biases).
    # Intermediates are re-quantized to bf16 between stages -> loose tolerances.
    fbf16 = fold_bottleneck_params(params, jnp.bfloat16)
    y_bf = jax.block_until_ready(
        jax.jit(bottleneck_forward)(x.astype(jnp.bfloat16), fbf16))
    np.testing.assert_allclose(np.asarray(y_bf.astype(jnp.float32)),
                               np.asarray(y_ref), atol=2.5e-1, rtol=2.5e-1)

    print("KERNEL_OK")
</pallas_src>

<mosaic_0001>
module attributes {stable_mosaic.version = 11 : i64} {
  func.func @_bottleneck_kernel(%arg0: i32, %arg1: memref<1x16x16x64xf32, #tpu.memory_space<vmem>>, %arg2: memref<64x16xf32, #tpu.memory_space<vmem>>, %arg3: memref<3x48x16xf32, #tpu.memory_space<vmem>>, %arg4: memref<16x64xf32, #tpu.memory_space<vmem>>, %arg5: memref<1x16xf32, #tpu.memory_space<vmem>>, %arg6: memref<1x16xf32, #tpu.memory_space<vmem>>, %arg7: memref<1x64xf32, #tpu.memory_space<vmem>>, %arg8: memref<1x16x16x64xf32, #tpu.memory_space<vmem>>, %arg9: memref<18x16x48xf32, #tpu.memory_space<vmem>>) attributes {dimension_semantics = [#tpu.dimension_semantics<parallel>], iteration_bounds = array<i64: 2>, scalar_prefetch = 0 : i64, scratch_operands = 1 : i64, tpu.core_type = #tpu.core_type<tc>, window_params = [{transform_indices = @transform_0, window_bounds = array<i64: 1, 16, 16, 64>}, {pipeline_mode = #tpu.pipeline_mode<synchronous>, transform_indices = @transform_1, window_bounds = array<i64: 64, 16>}, {pipeline_mode = #tpu.pipeline_mode<synchronous>, transform_indices = @transform_2, window_bounds = array<i64: 3, 48, 16>}, {pipeline_mode = #tpu.pipeline_mode<synchronous>, transform_indices = @transform_3, window_bounds = array<i64: 16, 64>}, {pipeline_mode = #tpu.pipeline_mode<synchronous>, transform_indices = @transform_4, window_bounds = array<i64: 1, 16>}, {pipeline_mode = #tpu.pipeline_mode<synchronous>, transform_indices = @transform_5, window_bounds = array<i64: 1, 16>}, {pipeline_mode = #tpu.pipeline_mode<synchronous>, transform_indices = @transform_6, window_bounds = array<i64: 1, 64>}, {transform_indices = @transform_7, window_bounds = array<i64: 1, 16, 16, 64>}]} {
    %c0 = arith.constant 0 : index
    %c0_0 = arith.constant 0 : index
    %c0_1 = arith.constant 0 : index
    %c0_2 = arith.constant 0 : index
    %0 = vector.load %arg1[%c0, %c0_0, %c0_1, %c0_2] : memref<1x16x16x64xf32, #tpu.memory_space<vmem>>, vector<1x16x16x64xf32>
    %1 = vector.shape_cast %0 : vector<1x16x16x64xf32> to vector<16x16x64xf32>
    %2 = vector.shape_cast %1 : vector<16x16x64xf32> to vector<256x64xf32>
    %c0_3 = arith.constant 0 : index
    %c0_4 = arith.constant 0 : index
    %3 = vector.load %arg2[%c0_3, %c0_4] : memref<64x16xf32, #tpu.memory_space<vmem>>, vector<64x16xf32>
    %cst = arith.constant dense<0.000000e+00> : vector<256x16xf32>
    %4 = tpu.matmul %2, %3, %cst {dimension_numbers = #tpu.dot_dimension_numbers<[1], [0], [0], [1], [0, 0, 1, 1], [], []>} : vector<256x64xf32>, vector<64x16xf32>, vector<256x16xf32> -> vector<256x16xf32>
    %c0_5 = arith.constant 0 : index
    %c0_6 = arith.constant 0 : index
    %5 = vector.load %arg5[%c0_5, %c0_6] : memref<1x16xf32, #tpu.memory_space<vmem>>, vector<1x16xf32>
    %6 = vector.broadcast %5 : vector<1x16xf32> to vector<256x16xf32>
    %7 = arith.addf %4, %6 : vector<256x16xf32>
    %cst_7 = arith.constant 0.000000e+00 : f32
    %8 = vector.broadcast %cst_7 : f32 to vector<256x16xf32>
    %9 = arith.maximumf %7, %8 : vector<256x16xf32>
    %10 = vector.shape_cast %9 : vector<256x16xf32> to vector<16x16x16xf32>
    %cst_8 = arith.constant 0.000000e+00 : f32
    %11 = vector.broadcast %cst_8 : f32 to vector<16x1x16xf32>
    %12 = vector.extract_strided_slice %10 {offsets = [0, 0, 0], sizes = [16, 15, 16], strides = [1, 1, 1]} : vector<16x16x16xf32> to vector<16x15x16xf32>
    %13 = tpu.concatenate %11, %12 in 1 : vector<16x1x16xf32>, vector<16x15x16xf32> -> vector<16x16x16xf32>
    %14 = vector.extract_strided_slice %10 {offsets = [0, 1, 0], sizes = [16, 15, 16], strides = [1, 1, 1]} : vector<16x16x16xf32> to vector<16x15x16xf32>
    %15 = tpu.concatenate %14, %11 in 1 : vector<16x15x16xf32>, vector<16x1x16xf32> -> vector<16x16x16xf32>
    %16 = tpu.concatenate %13, %10, %15 in 2 : vector<16x16x16xf32>, vector<16x16x16xf32>, vector<16x16x16xf32> -> vector<16x16x48xf32>
    %cst_9 = arith.constant 0.000000e+00 : f32
    %17 = vector.broadcast %cst_9 : f32 to vector<16x48xf32>
    %c0_10 = arith.constant 0 : index
    %c0_11 = arith.constant 0 : index
    %c0_12 = arith.constant 0 : index
    %18 = vector.load %arg9[%c0_10, %c0_11, %c0_12] : memref<18x16x48xf32, #tpu.memory_space<vmem>>, vector<1x16x48xf32>
    %19 = vector.shape_cast %18 : vector<1x16x48xf32> to vector<16x48xf32>
    %20 = vector.shape_cast %17 : vector<16x48xf32> to vector<1x16x48xf32>
    tpu.vector_store %arg9[%c0_10, %c0_11, %c0_12], %20 {strides = array<i32>} : memref<18x16x48xf32, #tpu.memory_space<vmem>>, vector<1x16x48xf32>,
    %c1 = arith.constant 1 : index
    %c0_13 = arith.constant 0 : index
    %c0_14 = arith.constant 0 : index
    %21 = vector.load %arg9[%c1, %c0_13, %c0_14] : memref<18x16x48xf32, #tpu.memory_space<vmem>>, vector<16x16x48xf32>
    tpu.vector_store %arg9[%c1, %c0_13, %c0_14], %16 {strides = array<i32>} : memref<18x16x48xf32, #tpu.memory_space<vmem>>, vector<16x16x48xf32>,
    %c17 = arith.constant 17 : index
    %c0_15 = arith.constant 0 : index
    %c0_16 = arith.constant 0 : index
    %22 = vector.load %arg9[%c17, %c0_15, %c0_16] : memref<18x16x48xf32, #tpu.memory_space<vmem>>, vector<1x16x48xf32>
    %23 = vector.shape_cast %22 : vector<1x16x48xf32> to vector<16x48xf32>
    %24 = vector.shape_cast %17 : vector<16x48xf32> to vector<1x16x48xf32>
    tpu.vector_store %arg9[%c17, %c0_15, %c0_16], %24 {strides = array<i32>} : memref<18x16x48xf32, #tpu.memory_space<vmem>>, vector<1x16x48xf32>,
    %c0_17 = arith.constant 0 : index
    %c0_18 = arith.constant 0 : index
    %c0_19 = arith.constant 0 : index
    %25 = vector.load %arg9[%c0_17, %c0_18, %c0_19] : memref<18x16x48xf32, #tpu.memory_space<vmem>>, vector<16x16x48xf32>
    %26 = vector.shape_cast %25 : vector<16x16x48xf32> to vector<256x48xf32>
    %c0_20 = arith.constant 0 : index
    %c0_21 = arith.constant 0 : index
    %c0_22 = arith.constant 0 : index
    %27 = vector.load %arg3[%c0_20, %c0_21, %c0_22] : memref<3x48x16xf32, #tpu.memory_space<vmem>>, vector<1x48x16xf32>
    %28 = vector.shape_cast %27 : vector<1x48x16xf32> to vector<48x16xf32>
    %cst_23 = arith.constant dense<0.000000e+00> : vector<256x16xf32>
    %29 = tpu.matmul %26, %28, %cst_23 {dimension_numbers = #tpu.dot_dimension_numbers<[1], [0], [0], [1], [0, 0, 1, 1], [], []>} : vector<256x48xf32>, vector<48x16xf32>, vector<256x16xf32> -> vector<256x16xf32>
    %c1_24 = arith.constant 1 : index
    %c0_25 = arith.constant 0 : index
    %c0_26 = arith.constant 0 : index
    %30 = vector.load %arg9[%c1_24, %c0_25, %c0_26] : memref<18x16x48xf32, #tpu.memory_space<vmem>>, vector<16x16x48xf32>
    %31 = vector.shape_cast %30 : vector<16x16x48xf32> to vector<256x48xf32>
    %c1_27 = arith.constant 1 : index
    %c0_28 = arith.constant 0 : index
    %c0_29 = arith.constant 0 : index
    %32 = vector.load %arg3[%c1_27, %c0_28, %c0_29] : memref<3x48x16xf32, #tpu.memory_space<vmem>>, vector<1x48x16xf32>
    %33 = vector.shape_cast %32 : vector<1x48x16xf32> to vector<48x16xf32>
    %cst_30 = arith.constant dense<0.000000e+00> : vector<256x16xf32>
    %34 = tpu.matmul %31, %33, %cst_30 {dimension_numbers = #tpu.dot_dimension_numbers<[1], [0], [0], [1], [0, 0, 1, 1], [], []>} : vector<256x48xf32>, vector<48x16xf32>, vector<256x16xf32> -> vector<256x16xf32>
    %35 = arith.addf %29, %34 : vector<256x16xf32>
    %c2 = arith.constant 2 : index
    %c0_31 = arith.constant 0 : index
    %c0_32 = arith.constant 0 : index
    %36 = vector.load %arg9[%c2, %c0_31, %c0_32] : memref<18x16x48xf32, #tpu.memory_space<vmem>>, vector<16x16x48xf32>
    %37 = vector.shape_cast %36 : vector<16x16x48xf32> to vector<256x48xf32>
    %c2_33 = arith.constant 2 : index
    %c0_34 = arith.constant 0 : index
    %c0_35 = arith.constant 0 : index
    %38 = vector.load %arg3[%c2_33, %c0_34, %c0_35] : memref<3x48x16xf32, #tpu.memory_space<vmem>>, vector<1x48x16xf32>
    %39 = vector.shape_cast %38 : vector<1x48x16xf32> to vector<48x16xf32>
    %cst_36 = arith.constant dense<0.000000e+00> : vector<256x16xf32>
    %40 = tpu.matmul %37, %39, %cst_36 {dimension_numbers = #tpu.dot_dimension_numbers<[1], [0], [0], [1], [0, 0, 1, 1], [], []>} : vector<256x48xf32>, vector<48x16xf32>, vector<256x16xf32> -> vector<256x16xf32>
    %41 = arith.addf %35, %40 : vector<256x16xf32>
    %c0_37 = arith.constant 0 : index
    %c0_38 = arith.constant 0 : index
    %42 = vector.load %arg6[%c0_37, %c0_38] : memref<1x16xf32, #tpu.memory_space<vmem>>, vector<1x16xf32>
    %43 = vector.broadcast %42 : vector<1x16xf32> to vector<256x16xf32>
    %44 = arith.addf %41, %43 : vector<256x16xf32>
    %cst_39 = arith.constant 0.000000e+00 : f32
    %45 = vector.broadcast %cst_39 : f32 to vector<256x16xf32>
    %46 = arith.maximumf %44, %45 : vector<256x16xf32>
    %c0_40 = arith.constant 0 : index
    %c0_41 = arith.constant 0 : index
    %47 = vector.load %arg4[%c0_40, %c0_41] : memref<16x64xf32, #tpu.memory_space<vmem>>, vector<16x64xf32>
    %cst_42 = arith.constant dense<0.000000e+00> : vector<256x64xf32>
    %48 = tpu.matmul %46, %47, %cst_42 {dimension_numbers = #tpu.dot_dimension_numbers<[1], [0], [0], [1], [0, 0, 1, 1], [], []>} : vector<256x16xf32>, vector<16x64xf32>, vector<256x64xf32> -> vector<256x64xf32>
    %c0_43 = arith.constant 0 : index
    %c0_44 = arith.constant 0 : index
    %49 = vector.load %arg7[%c0_43, %c0_44] : memref<1x64xf32, #tpu.memory_space<vmem>>, vector<1x64xf32>
    %50 = vector.broadcast %49 : vector<1x64xf32> to vector<256x64xf32>
    %51 = arith.addf %48, %50 : vector<256x64xf32>
    %c0_45 = arith.constant 0 : index
    %c0_46 = arith.constant 0 : index
    %c0_47 = arith.constant 0 : index
    %c0_48 = arith.constant 0 : index
    %52 = vector.load %arg1[%c0_45, %c0_46, %c0_47, %c0_48] : memref<1x16x16x64xf32, #tpu.memory_space<vmem>>, vector<1x16x16x64xf32>
    %53 = vector.shape_cast %52 : vector<1x16x16x64xf32> to vector<16x16x64xf32>
    %54 = vector.shape_cast %53 : vector<16x16x64xf32> to vector<256x64xf32>
    %55 = arith.addf %51, %54 : vector<256x64xf32>
    %cst_49 = arith.constant 0.000000e+00 : f32
    %56 = vector.broadcast %cst_49 : f32 to vector<256x64xf32>
    %57 = arith.maximumf %55, %56 : vector<256x64xf32>
    %58 = vector.shape_cast %57 : vector<256x64xf32> to vector<16x16x64xf32>
    %c0_50 = arith.constant 0 : index
    %c0_51 = arith.constant 0 : index
    %c0_52 = arith.constant 0 : index
    %c0_53 = arith.constant 0 : index
    %59 = vector.load %arg8[%c0_50, %c0_51, %c0_52, %c0_53] : memref<1x16x16x64xf32, #tpu.memory_space<vmem>>, vector<1x16x16x64xf32>
    %60 = vector.shape_cast %59 : vector<1x16x16x64xf32> to vector<16x16x64xf32>
    %61 = vector.shape_cast %58 : vector<16x16x64xf32> to vector<1x16x16x64xf32>
    tpu.vector_store %arg8[%c0_50, %c0_51, %c0_52, %c0_53], %61 {strides = array<i32>} : memref<1x16x16x64xf32, #tpu.memory_space<vmem>>, vector<1x16x16x64xf32>,
    return
  }
  func.func @transform_0(%arg0: i32) -> (i32, i32, i32, i32) {
    %c0_i32 = arith.constant 0 : i32
    %c0_i32_0 = arith.constant 0 : i32
    %c0_i32_1 = arith.constant 0 : i32
    %c0_i32_2 = arith.constant 0 : i32
    return %arg0, %c0_i32, %c0_i32_0, %c0_i32_1 : i32, i32, i32, i32
  }
  func.func @transform_1(%arg0: i32) -> (i32, i32) {
    %c0_i32 = arith.constant 0 : i32
    %c0_i32_0 = arith.constant 0 : i32
    %c0_i32_1 = arith.constant 0 : i32
    return %c0_i32, %c0_i32_0 : i32, i32
  }
  func.func @transform_2(%arg0: i32) -> (i32, i32, i32) {
    %c0_i32 = arith.constant 0 : i32
    %c0_i32_0 = arith.constant 0 : i32
    %c0_i32_1 = arith.constant 0 : i32
    %c0_i32_2 = arith.constant 0 : i32
    return %c0_i32, %c0_i32_0, %c0_i32_1 : i32, i32, i32
  }
  func.func @transform_3(%arg0: i32) -> (i32, i32) {
    %c0_i32 = arith.constant 0 : i32
    %c0_i32_0 = arith.constant 0 : i32
    %c0_i32_1 = arith.constant 0 : i32
    return %c0_i32, %c0_i32_0 : i32, i32
  }
  func.func @transform_4(%arg0: i32) -> (i32, i32) {
    %c0_i32 = arith.constant 0 : i32
    %c0_i32_0 = arith.constant 0 : i32
    %c0_i32_1 = arith.constant 0 : i32
    return %c0_i32, %c0_i32_0 : i32, i32
  }
  func.func @transform_5(%arg0: i32) -> (i32, i32) {
    %c0_i32 = arith.constant 0 : i32
    %c0_i32_0 = arith.constant 0 : i32
    %c0_i32_1 = arith.constant 0 : i32
    return %c0_i32, %c0_i32_0 : i32, i32
  }
  func.func @transform_6(%arg0: i32) -> (i32, i32) {
    %c0_i32 = arith.constant 0 : i32
    %c0_i32_0 = arith.constant 0 : i32
    %c0_i32_1 = arith.constant 0 : i32
    return %c0_i32, %c0_i32_0 : i32, i32
  }
  func.func @transform_7(%arg0: i32) -> (i32, i32, i32, i32) {
    %c0_i32 = arith.constant 0 : i32
    %c0_i32_0 = arith.constant 0 : i32
    %c0_i32_1 = arith.constant 0 : i32
    %c0_i32_2 = arith.constant 0 : i32
    return %arg0, %c0_i32, %c0_i32_0, %c0_i32_1 : i32, i32, i32, i32
  }
}

</mosaic_0001>

<bundles_post_ra>
// kernel: bottleneck_forward.1
= control target key start
LH: loop header
LB: loop body
LE: loop exit
PB: predicated region body
PF: predicated region fallthrough
CT: control target
= control target key end

     0   :  { %12 = vsyncpa [#allocation4], 0  ;;  %s5195_s0 = inlined_call_operand.hbm [shape: f32[2,16,16,64], index: 0, kind: input, shape index: {}]   ;;  %s5196_s1 = inlined_call_operand.vmem [shape: f32[64,16], index: 1, kind: input, shape index: {}]   ;;  %s5197_s2 = inlined_call_operand.vmem [shape: f32[3,48,16], index: 2, kind: input, shape index: {}]   ;;  %s5198_s3 = inlined_call_operand.vmem [shape: f32[16,64], index: 3, kind: input, shape index: {}]   ;;  %s5199_s4 = inlined_call_operand.vmem [shape: f32[1,16], index: 4, kind: input, shape index: {}]   ;;  %s5200_s5 = inlined_call_operand.vmem [shape: f32[1,16], index: 5, kind: input, shape index: {}]   ;;  %s5201_s6 = inlined_call_operand.vmem [shape: f32[1,64], index: 6, kind: input, shape index: {}]   ;;  %s5202_s7 = inlined_call_operand.hbm [shape: f32[2,16,16,64], index: 7, kind: output, shape index: {}]  }
   0x1   :  { %14 = vsyncpa [#allocation4 + $0x1], 0 }
   0x2   :  { %15 = vsyncpa [#allocation5], 0 }
   0x3   :  { %17 = vsyncpa [#allocation5 + $0x1], 0  ;;  %s3832_s24 = smov 0   ;;  %s3834_s25 = smov 0  }
   0x4   :  { %s3836_s26 = smov 0   ;;  %s3838_s27 = smov 0  }
   0x5 LB: > { %s3853_s28 = sadd.s32 4294967295, %s3781_s27   ;;  %s2949_s29 = sadd.s32 4294967294, %s3781_s27   ;;  %s3781_s27 = sphi %s3838_s27, %s5253_s27   ;;  %s3777_s26 = sphi %s3836_s26, %s5252_s26   ;;  %s3773_s25 = sphi %s3834_s25, %s5251_s25   ;;  %s3769_s24 = sphi %s3832_s24, %s5250_s24  }
   0x6   : > { %s3857_s30 = sadd.s32 1, %s3781_s27   ;;  %s30_s8 = sadd.s32 1, %s3777_s26 }
   0x7   : > { %s27_s9 = ssub.s32 %s3781_s27, %s3857_s30  ;;  %p37_p0 = scmp.ne.s32.totalorder %s3777_s26, %s3773_s25 }
   0x8   : > { %p28_p1 = scmp.eq.s32.totalorder %s27_s9, 0  ;;  %p38_p2 = scmp.eq.s32.totalorder %s3781_s27, 0 }
   0x9   : > { %p43_p3 = scmp.ne.s32.totalorder %s3773_s25, %s3769_s24  ;;  %p44_p4 = scmp.eq.s32.totalorder %s3853_s28, 0 }
   0xa   : > { %s3869_s10 = scalar_select %p28_p1, %s3777_s26, %s30_s8  }
   0xb   : > { %p3871_p5 = por %p38_p2, %p37_p0  ;;  %p3875_p6 = por %p44_p4, %p43_p3 }
   0xc   : > { %p193_p7 = scmp.eq.s32.totalorder %s3853_s28, 1  ;;  %p199_p8 = scmp.eq.s32.totalorder %s2949_s29, 1 }
   0xd   : > { %s5214_s12 = scalar_select %p3875_p6, 1, 0 }
   0xe   : > { %p3648_p10 = scmp.lt.s32.totalorder %s3781_s27, 2  ;;  %p3882_p11 = por %p193_p7, %p37_p0 }
   0xf   : > { %p3886_p12 = por %p199_p8, %p43_p3  ;;  %s237_s15 = sand.u32 1, %s3777_s26  }
  0x10   : > { %s5215_s13 = scalar_select %p3882_p11, 1, 0 }
  0x11   : > { %s5216_s14 = scalar_select %p3886_p12, 1, 0 }
  0x12   : > { %s3138_s16 = sshll.u32 %s3781_s27, 12  ;;  %s2952_s17 = sshll.u32 %s237_s15, 8 }
  0x13   : > { %s3895_s20 = scalar_lea.hbm %s5195_s0, %s3138_s16  ;;  %s241_s21 = scalar_lea.vmem [#allocation3], %s2952_s17 }
  0x14   : > { %s248_s22 = sshll.u32 %s241_s21, 4  ;;  %p3899_p13 = pnand %p3648_p10, %p3871_p5  ;;  %s3903_s22 = int_to_ptr.vmem [resolvable:$true] %s248_s22 }
  0x15   : > { %s3905_s29 = scalar_lea.sflag [#allocation4], %s237_s15  ;;  %s3689_s8 = scalar_lea.hbm %s3895_s20, 4096 }
  0x16   : > { %p3690_p0 = scmp.ne.s32.totalorder %s3895_s20, %s3689_s8  ;;  %p3691_p1 = pneg %p3899_p13 }
  0x17   : > { %s3694_s17 = scalar_lea.hbm %s5195_s0, 8192  ;;  %p3695_p4 = scmp.lt.s32.totalorder %s3895_s20, %s5195_s0 }
  0x18   : > { %p3692_p2 = pnand %p3691_p1, %p3690_p0  ;;  %p3696_p5 = scmp.lt.s32.totalorder %s3694_s17, %s3689_s8 }
  0x1a   : > { %p3693_p3 = pneg %p3692_p2  ;;  %p3697_p7 = por %p3696_p5, %p3695_p4 }
  0x1c   : > { %p3698_p8 = pnand %p3697_p7, %p3693_p3 }
  0x1e   : > { %3701 = shalt.err (!%p3698_p8)
}
  0x1f   : > { %s3702_s15 = scalar_lea.vmem %s3903_s22, 4096  ;;  %s3783_s19 = smov [#allocation3]  }
  0x20   : > { %p3703_p10 = scmp.ne.s32.totalorder %s3903_s22, %s3702_s15  ;;  %s3707_s21 = sshll.u32 %s3783_s19, 4  ;;  %s3708_s21 = int_to_ptr.vmem [resolvable:$false] %s3707_s21 }
  0x21   : > { %s3709_s9 = scalar_lea.vmem %s3708_s21, 8192  ;;  %p3710_p2 = scmp.lt.s32.totalorder %s3903_s22, %s3708_s21 }
  0x22   : > { %p3705_p9 = pnand %p3703_p10, %p3691_p1  ;;  %p3711_p12 = scmp.lt.s32.totalorder %s3709_s9, %s3702_s15 }
  0x24   : > { %p3706_p0 = pneg %p3705_p9  ;;  %p3712_p11 = por %p3711_p12, %p3710_p2 }
  0x26   : > { %p3713_p6 = pnand %p3712_p11, %p3706_p0 }
  0x28   : > { %3716 = shalt.err (!%p3713_p6)
}
  0x29   : > { %s3784_s8 = smov 128   ;;  %s3785_s16 = smov 8  }
  0x2a   : > { %3643 = dma.hbm_to_vmem [thread:$0]  (!%p3899_p13), %s3895_s20, 4096, %s3903_s22, %s3905_s29, %s3784_s8, %s3784_s8, %s3785_s16  }
  0x2b   : > { %p2955_p9 = scmp.ge.s32.totalorder %s3781_s27, 1  ;;  %p256_p1 = scmp.lt.s32.totalorder %s3781_s27, 3 }
  0x2d   : > { %p257_p3 = pnand %p2955_p9, %p256_p1 }
  0x2f   : > { %260 = sbr.rel (%p257_p3) target bundleno = 1003 (0x3eb), region = 48 }
  0x34   : > { %s3929_s17 = sand.u32 1, %s3773_s25   ;;  %p5218_p6 = scmp.ne.s32.totalorder %s5214_s12, 0 }
  0x35   : > { %s2956_s11 = sshll.u32 %s3929_s17, 8  ;;  %s263_s18 = scalar_lea.sflag [#allocation4], %s3929_s17 }
  0x36   : > { %s3935_s15 = scalar_lea.vmem [#allocation3], %s2956_s11 }
  0x37   : > { %3760 = dma.done.wait (%p5218_p6), %s263_s18, 4096  }
  0x38   : > { %3762 = vsyncadd (%p5218_p6), %s263_s18, 4294963200  ;;  %v336_v0 = vld [vmem:[%s5196_s1 + $0x38] sm:$0xff]  ;;  %v335_v1 = vld [vmem:[%s5196_s1 + $0x30] sm:$0xff]  ;;  %vm344_vm0 = vcmask 523264   ;;  %vm827_vm1 = vcmask 1046528   ;;  %s3786_s12 = smov 16  }
  0x39   : > { %3328 = vmatprep.subr.mxu0 %v336_v0  ;;  %v334_v2 = vld [vmem:[%s5196_s1 + $0x28] sm:$0xff]  ;;  %v297_v3 = vld [vmem:[%s3935_s15] sm:$0xff]  ;;  %v332_v5 = vld [vmem:[%s5196_s1 + $0x18] sm:$0xff]  ;;  %vm730_vm2 = vcmask 1040384   ;;  %s3787_s16 = smov 32   ;;  %vm1116_vm3 = vcmask 130048  }
  0x3a   : > { %3329 = vmatpush3.msra.mxu0 %v336_v0  ;;  %3344 = vmatprep.mubr.msk.f32.mxu0 %vm344_vm0, %v297_v3  ;;  %v333_v4 = vld [vmem:[%s5196_s1 + $0x20] sm:$0xff]  ;;  %v331_v6 = vld [vmem:[%s5196_s1 + $0x10] sm:$0xff]  ;;  %v330_v7 = vld [vmem:[%s5196_s1 + $0x8] sm:$0xff]  ;;  %vm1149_vm4 = vcmask 261120   ;;  %vm1182_vm5 = vcmask 392192   ;;  %p5247_p12 = scmp.ne.s32.totalorder %s5215_s13, 0 }
  0x3b   : > { %3330 = vmatprep.subr.mxu0 %v335_v1  ;;  %v329_v8 = vld [vmem:[%s5196_s1] sm:$0xff]  ;;  %v298_v9 = vld [vmem:[%s3935_s15 + $0x8] sm:$0xff]  ;;  %v299_v10 = vld [vmem:[%s3935_s15 + $0x10] sm:$0xff]  ;;  %s3789_s29 = smov [#allocation6]  }
  0x3c   : > { %3331 = vmatpush3.msra.mxu0 %v335_v1  ;;  %v300_v11 = vld [vmem:[%s3935_s15 + $0x18] sm:$0xff]  ;;  %v301_v12 = vld [vmem:[%s3935_s15 + $0x20] sm:$0xff]  ;;  %v302_v13 = vld [vmem:[%s3935_s15 + $0x28] sm:$0xff]  ;;  %s3721_s19 = sshll.u32 %s3789_s29, 4  ;;  %s3722_s19 = int_to_ptr.vmem [resolvable:$false] %s3721_s19 }
  0x3d   : > { %3332 = vmatprep.subr.mxu0 %v334_v2  ;;  %v303_v14 = vld [vmem:[%s3935_s15 + $0x30] sm:$0xff]  ;;  %v304_v15 = vld [vmem:[%s3935_s15 + $0x38] sm:$0xff]  ;;  %v305_v16 = vld [vmem:[%s3935_s15 + $0x40] sm:$0xff]  ;;  %s3723_s21 = scalar_lea.vmem %s3722_s19, 8192 }
  0x3e   : > { %3333 = vmatpush3.msra.mxu0 %v334_v2  ;;  %v306_v17 = vld [vmem:[%s3935_s15 + $0x48] sm:$0xff]  ;;  %v307_v18 = vld [vmem:[%s3935_s15 + $0x50] sm:$0xff]  ;;  %v308_v19 = vld [vmem:[%s3935_s15 + $0x58] sm:$0xff] }
  0x3f   : > { %3334 = vmatprep.subr.mxu0 %v333_v4  ;;  %v309_v20 = vld [vmem:[%s3935_s15 + $0x60] sm:$0xff]  ;;  %v310_v21 = vld [vmem:[%s3935_s15 + $0x68] sm:$0xff]  ;;  %v311_v22 = vld [vmem:[%s3935_s15 + $0x70] sm:$0xff] }
  0x40   : > { %3335 = vmatpush3.msra.mxu0 %v333_v4  ;;  %v312_v23 = vld [vmem:[%s3935_s15 + $0x78] sm:$0xff]  ;;  %v313_v24 = vld [vmem:[%s3935_s15 + $0x80] sm:$0xff]  ;;  %v314_v25 = vld [vmem:[%s3935_s15 + $0x88] sm:$0xff] }
  0x41   : > { %3336 = vmatprep.subr.mxu0 %v332_v5  ;;  %v315_v26 = vld [vmem:[%s3935_s15 + $0x90] sm:$0xff]  ;;  %v316_v27 = vld [vmem:[%s3935_s15 + $0x98] sm:$0xff]  ;;  %v317_v28 = vld [vmem:[%s3935_s15 + $0xa0] sm:$0xff] }
  0x42   : > { %3337 = vmatpush3.msra.mxu0 %v332_v5  ;;  %v318_v29 = vld [vmem:[%s3935_s15 + $0xa8] sm:$0xff]  ;;  %v319_v30 = vld [vmem:[%s3935_s15 + $0xb0] sm:$0xff]  ;;  %v320_v31 = vld [vmem:[%s3935_s15 + $0xb8] sm:$0xff] }
  0x43   : > { %3338 = vmatprep.subr.mxu0 %v331_v6  ;;  %v321_v32 = vld [vmem:[%s3935_s15 + $0xc0] sm:$0xff]  ;;  %v322_v33 = vld [vmem:[%s3935_s15 + $0xc8] sm:$0xff]  ;;  %v323_v34 = vld [vmem:[%s3935_s15 + $0xd0] sm:$0xff] }
  0x44   : > { %3339 = vmatpush3.msra.mxu0 %v331_v6  ;;  %v324_v35 = vld [vmem:[%s3935_s15 + $0xd8] sm:$0xff]  ;;  %v325_v36 = vld [vmem:[%s3935_s15 + $0xe0] sm:$0xff]  ;;  %v326_v37 = vld [vmem:[%s3935_s15 + $0xe8] sm:$0xff] }
  0x45   : > { %3340 = vmatprep.subr.mxu0 %v330_v7  ;;  %v327_v38 = vld [vmem:[%s3935_s15 + $0xf0] sm:$0xff]  ;;  %v328_v39 = vld [vmem:[%s3935_s15 + $0xf8] sm:$0xff]  ;;  %v4035_v41 = vld [vmem:[%s5199_s4] ss:$0 sm:$0xff] }
  0x46   : > { %3341 = vmatpush3.msra.mxu0 %v330_v7  ;;  %v2996_v40 = vld [vmem:[%s5197_s2 + $0x58] sm:$0xff]  ;;  %v2995_v42 = vld [vmem:[%s5197_s2 + $0x50] sm:$0xff]  ;;  %v2994_v44 = vld [vmem:[%s5197_s2 + $0x48] sm:$0xff] }
  0x47   : > { %3342 = vmatprep.subr.mxu0 %v329_v8  ;;  %3624 = vmatprep.subr.mxu1 %v2996_v40  ;;  %v2993_v49 = vld [vmem:[%s5197_s2 + $0x40] sm:$0xff]  ;;  %v2992_v51 = vld [vmem:[%s5197_s2 + $0x38] sm:$0xff]  ;;  %v2991_v60 = vld [vmem:[%s5197_s2 + $0x30] sm:$0xff] }
  0x48   : > { %3343 = vmatpush3.msra.mxu0 %v329_v8  ;;  %3630 = vmatpush3.msra.mxu1 %v2996_v40 }
  0x49   : > { %3345 = vmatmul.mubr.msk.f32.vlgmr.msra.gmra.mxu0 %vm344_vm0, %v298_v9  ;;  %3392 = vmatprep.subr.mxu0 %v2996_v40 }
  0x4a   : > { %3347 = vmatprep.mubr.msk.f32.mxu0 %vm344_vm0, %v299_v10  ;;  %3393 = vmatpush3.msra.mxu0 %v2996_v40 }
  0x4b   : > { %3394 = vmatprep.subr.mxu0 %v2995_v42  ;;  %3625 = vmatprep.subr.mxu1 %v2995_v42 }
  0x4c   : > { %3395 = vmatpush3.msra.mxu0 %v2995_v42  ;;  %3631 = vmatpush3.msra.mxu1 %v2995_v42 }
  0x4d   : > { %3348 = vmatmul.mubr.msk.f32.gmra.mxu0 %vm344_vm0, %v300_v11  ;;  %3396 = vmatprep.subr.mxu0 %v2994_v44 }
  0x4e   : > { %3350 = vmatprep.mubr.msk.f32.mxu0 %vm344_vm0, %v301_v12  ;;  %3626 = vmatprep.subr.mxu1 %v2994_v44 }
  0x4f   : > { %3397 = vmatpush3.msra.mxu0 %v2994_v44  ;;  %3632 = vmatpush3.msra.mxu1 %v2994_v44 }
  0x50   : > { %3398 = vmatprep.subr.mxu0 %v2993_v49  ;;  %3627 = vmatprep.subr.mxu1 %v2993_v49 }
  0x51   : > { %3351 = vmatmul.mubr.msk.f32.gmra.mxu0 %vm344_vm0, %v302_v13  ;;  %3633 = vmatpush3.msra.mxu1 %v2993_v49 }
  0x52   : > { %3353 = vmatprep.mubr.msk.f32.mxu0 %vm344_vm0, %v303_v14  ;;  %3399 = vmatpush3.msra.mxu0 %v2993_v49 }
  0x53   : > { %3400 = vmatprep.subr.mxu0 %v2992_v51  ;;  %3628 = vmatprep.subr.mxu1 %v2992_v51 }
  0x54   : > { %3401 = vmatpush3.msra.mxu0 %v2992_v51  ;;  %3634 = vmatpush3.msra.mxu1 %v2992_v51 }
  0x55   : > { %3354 = vmatmul.mubr.msk.f32.gmra.mxu0 %vm344_vm0, %v304_v15  ;;  %3402 = vmatprep.subr.mxu0 %v2991_v60 }
  0x56   : > { %3356 = vmatprep.mubr.msk.f32.mxu0 %vm344_vm0, %v305_v16  ;;  %3403 = vmatpush3.msra.mxu0 %v2991_v60 }
  0x57   : > { %3629 = vmatprep.subr.mxu1 %v2991_v60 }
  0x58   : > { %3635 = vmatpush3.msra.mxu1 %v2991_v60 }
  0x59   : > { %3357 = vmatmul.mubr.msk.f32.gmra.mxu0 %vm344_vm0, %v306_v17 }
  0x5a   : > { %3359 = vmatprep.mubr.msk.f32.mxu0 %vm344_vm0, %v307_v18 }
  0x5d   : > { %3360 = vmatmul.mubr.msk.f32.gmra.mxu0 %vm344_vm0, %v308_v19 }
  0x5e   : > { %3362 = vmatprep.mubr.msk.f32.mxu0 %vm344_vm0, %v309_v20 }
  0x61   : > { %3363 = vmatmul.mubr.msk.f32.gmra.mxu0 %vm344_vm0, %v310_v21 }
  0x62   : > { %3365 = vmatprep.mubr.msk.f32.mxu0 %vm344_vm0, %v311_v22 }
  0x65   : > { %3366 = vmatmul.mubr.msk.f32.gmra.mxu0 %vm344_vm0, %v312_v23 }
  0x66   : > { %3368 = vmatprep.mubr.msk.f32.mxu0 %vm344_vm0, %v313_v24 }
  0x69   : > { %3369 = vmatmul.mubr.msk.f32.gmra.mxu0 %vm344_vm0, %v314_v25 }
  0x6a   : > { %3371 = vmatprep.mubr.msk.f32.mxu0 %vm344_vm0, %v315_v26 }
  0x6d   : > { %3372 = vmatmul.mubr.msk.f32.gmra.mxu0 %vm344_vm0, %v316_v27 }
  0x6e   : > { %3374 = vmatprep.mubr.msk.f32.mxu0 %vm344_vm0, %v317_v28 }
  0x71   : > { %3375 = vmatmul.mubr.msk.f32.gmra.mxu0 %vm344_vm0, %v318_v29 }
  0x72   : > { %3377 = vmatprep.mubr.msk.f32.mxu0 %vm344_vm0, %v319_v30 }
  0x75   : > { %3378 = vmatmul.mubr.msk.f32.gmra.mxu0 %vm344_vm0, %v320_v31 }
  0x76   : > { %3380 = vmatprep.mubr.msk.f32.mxu0 %vm344_vm0, %v321_v32 }
  0x79   : > { %3381 = vmatmul.mubr.msk.f32.gmra.mxu0 %vm344_vm0, %v322_v33 }
  0x7a   : > { %3383 = vmatprep.mubr.msk.f32.mxu0 %vm344_vm0, %v323_v34 }
  0x7d   : > { %3384 = vmatmul.mubr.msk.f32.gmra.mxu0 %vm344_vm0, %v324_v35 }
  0x7e   : > { %3386 = vmatprep.mubr.msk.f32.mxu0 %vm344_vm0, %v325_v36 }
  0x81   : > { %3387 = vmatmul.mubr.msk.f32.gmra.mxu0 %vm344_vm0, %v326_v37 }
  0x82   : > { %3389 = vmatprep.mubr.msk.f32.mxu0 %vm344_vm0, %v327_v38 }
  0x85   : > { %3390 = vmatmul.mubr.msk.f32.gmra.mxu0 %vm344_vm0, %v328_v39 }
 0x109   : > { %v3346_v43 = vpop.f32.mrf.mxu0 }
 0x10a   : > { %v513_v45 = vadd.f32 %v3346_v43, %v4035_v41 }
 0x10b   : > { %v507_v46 = vpop.f32.mrf.mxu0 }
 0x10c   : > { %v667_v47 = vmax.f32 %v513_v45, 0.0  ;;  %v508_v48 = vadd.f32 %v4035_v41, %v507_v46 }
 0x10d   : > { %v3349_v50 = vpop.f32.mrf.mxu0 }
 0x10e   : > { %v4051_v52 = vmax.f32 %v508_v48, 0.0  ;;  %910 = vrot.lane.b32.xlu1 %v667_v47, %s3786_s12  ;;  %v523_v53 = vadd.f32 %v3349_v50, %v4035_v41  ;;  %v829_v54 = vrot.slane %v667_v47, 1  ;;  %v732_v61 = vrot.slane %v667_v47, 7 }
 0x10f   : > { %v517_v55 = vpop.f32.mrf.mxu0 }
 0x110   : > { %v5212_v56 = vrot.slane %v4051_v52, 7  ;;  %v828_v57 = vrot.slane %v4051_v52, 1  ;;  %v669_v58 = vmax.f32 %v523_v53, 0.0  ;;  %v892_v59 = vsel %vm827_vm1, %v829_v54, 0.0 }
 0x111   : > { %1022 = vrot.lane.b32.xlu0 %v892_v59, %s3787_s16  ;;  %v518_v62 = vadd.f32 %v4035_v41, %v517_v55  ;;  %v3352_v63 = vpop.f32.mrf.mxu0 }
 0x112   : > { %908 = vrot.lane.b32.xlu1 %v4051_v52, %s3786_s12  ;;  %v533_v0 = vadd.f32 %v3352_v63, %v4035_v41  ;;  %v832_v1 = vrot.slane %v669_v58, 1  ;;  %v735_v2 = vrot.slane %v669_v58, 7  ;;  %v4071_v5 = vsel %vm730_vm2, %v5212_v56, %v732_v61 }
 0x113   : > { %v4066_v3 = vmax.f32 %v518_v62, 0.0  ;;  %v527_v4 = vpop.f32.mrf.mxu0  ;;  %v830_v6 = vsel %vm827_vm1, %v828_v57, %v829_v54 }
 0x114   : > { %v671_v7 = vmax.f32 %v533_v0, 0.0  ;;  %v528_v8 = vadd.f32 %v4035_v41, %v527_v4  ;;  %v893_v12 = vsel %vm827_vm1, %v832_v1, 0.0 }
 0x115   : > { %v5211_v9 = vrot.slane %v4066_v3, 7  ;;  %1020 = vrot.lane.b32.xlu0 %v830_v6, %s3787_s16  ;;  %v3355_v10 = vpop.f32.mrf.mxu0  ;;  %v831_v17 = vrot.slane %v4066_v3, 1 }
 0x116   : > { %914 = vrot.lane.b32.xlu1 %v669_v58, %s3786_s12  ;;  %v4078_v11 = vmax.f32 %v528_v8, 0.0  ;;  %v543_v13 = vadd.f32 %v3355_v10, %v4035_v41  ;;  %v738_v14 = vrot.slane %v671_v7, 7  ;;  %v835_v23 = vrot.slane %v671_v7, 1 }
 0x117   : > { %v537_v15 = vpop.f32.mrf.mxu0  ;;  %v4085_v16 = vsel %vm730_vm2, %v5211_v9, %v735_v2  ;;  %v833_v28 = vsel %vm827_vm1, %v831_v17, %v832_v1 }
 0x118   : > { %v5210_v18 = vrot.slane %v4078_v11, 7  ;;  %v4089_v19 = vmax.f32 %v543_v13, 0.0  ;;  %v538_v20 = vadd.f32 %v4035_v41, %v537_v15  ;;  %v894_v33 = vsel %vm827_vm1, %v835_v23, 0.0 }
 0x119   : > { %1026 = vrot.lane.b32.xlu0 %v893_v12, %s3787_s16  ;;  %v3358_v21 = vpop.f32.mrf.mxu0  ;;  %v834_v39 = vrot.slane %v4078_v11, 1 }
 0x11a   : > { %912 = vrot.lane.b32.xlu1 %v4066_v3, %s3786_s12  ;;  %v4095_v22 = vmax.f32 %v538_v20, 0.0  ;;  %v553_v24 = vadd.f32 %v3358_v21, %v4035_v41  ;;  %v741_v25 = vrot.slane %v4089_v19, 7  ;;  %v4102_v27 = vsel %vm730_vm2, %v5210_v18, %v738_v14 }
 0x11b   : > { %v547_v26 = vpop.f32.mrf.mxu0  ;;  %v838_v45 = vrot.slane %v4089_v19, 1  ;;  %v836_v51 = vsel %vm827_vm1, %v834_v39, %v835_v23 }
 0x11c   : > { %v5209_v29 = vrot.slane %v4095_v22, 7  ;;  %v4106_v30 = vmax.f32 %v553_v24, 0.0  ;;  %v548_v31 = vadd.f32 %v4035_v41, %v547_v26  ;;  %v837_v61 = vrot.slane %v4095_v22, 1 }
 0x11d   : > { %1024 = vrot.lane.b32.xlu0 %v833_v28, %s3787_s16  ;;  %v3361_v32 = vpop.f32.mrf.mxu0  ;;  %v895_v58 = vsel %vm827_vm1, %v838_v45, 0.0 }
 0x11e   : > { %918 = vrot.lane.b32.xlu1 %v671_v7, %s3786_s12  ;;  %v4112_v34 = vmax.f32 %v548_v31, 0.0  ;;  %v563_v35 = vadd.f32 %v3361_v32, %v4035_v41  ;;  %v744_v36 = vrot.slane %v4106_v30, 7  ;;  %v4119_v38 = vsel %vm730_vm2, %v5209_v29, %v741_v25 }
 0x11f   : > { %v557_v37 = vpop.f32.mrf.mxu0  ;;  %v841_v12 = vrot.slane %v4106_v30, 1  ;;  %v839_v23 = vsel %vm827_vm1, %v837_v61, %v838_v45 }
 0x120   : > { %v5208_v40 = vrot.slane %v4112_v34, 7  ;;  %v4123_v42 = vmax.f32 %v563_v35, 0.0  ;;  %v558_v43 = vadd.f32 %v4035_v41, %v557_v37  ;;  %v840_v35 = vrot.slane %v4112_v34, 1 }
 0x121   : > { %1030 = vrot.lane.b32.xlu0 %v894_v33, %s3787_s16  ;;  %v3364_v44 = vpop.f32.mrf.mxu0  ;;  %v896_v31 = vsel %vm827_vm1, %v841_v12, 0.0 }
 0x122   : > { %916 = vrot.lane.b32.xlu1 %v4078_v11, %s3786_s12  ;;  %v4130_v46 = vmax.f32 %v558_v43, 0.0  ;;  %v573_v47 = vadd.f32 %v3364_v44, %v4035_v41  ;;  %v747_v48 = vrot.slane %v4123_v42, 7  ;;  %v4137_v50 = vsel %vm730_vm2, %v5208_v40, %v744_v36 }
 0x123   : > { %v567_v49 = vpop.f32.mrf.mxu0 }
 0x124   : > { %v5207_v53 = vrot.slane %v4130_v46, 7  ;;  %v4141_v54 = vmax.f32 %v573_v47, 0.0  ;;  %v568_v55 = vadd.f32 %v4035_v41, %v567_v49  ;;  %v844_v47 = vrot.slane %v4123_v42, 1 }
 0x125   : > { %1028 = vrot.lane.b32.xlu0 %v836_v51, %s3787_s16  ;;  %v3367_v57 = vpop.f32.mrf.mxu0  ;;  %v842_v51 = vsel %vm827_vm1, %v840_v35, %v841_v12 }
 0x126   : > { %922 = vrot.lane.b32.xlu1 %v4089_v19, %s3786_s12  ;;  %v4148_v59 = vmax.f32 %v568_v55, 0.0  ;;  %v583_v60 = vadd.f32 %v3367_v57, %v4035_v41  ;;  %v750_v62 = vrot.slane %v4141_v54, 7  ;;  %v847_v0 = vrot.slane %v4141_v54, 1 }
 0x127   : > { %v577_v63 = vpop.f32.mrf.mxu0  ;;  %v4157_v1 = vsel %vm730_vm2, %v5207_v53, %v747_v48 }
 0x128   : > { %v749_v2 = vrot.slane %v4148_v59, 7  ;;  %v846_v4 = vrot.slane %v4148_v59, 1  ;;  %v4161_v6 = vmax.f32 %v583_v60, 0.0  ;;  %v578_v7 = vadd.f32 %v4035_v41, %v577_v63 }
 0x129   : > { %1034 = vrot.lane.b32.xlu0 %v895_v58, %s3787_s16  ;;  %v3370_v8 = vpop.f32.mrf.mxu0  ;;  %v4166_v10 = vsel %vm827_vm1, %v847_v0, 0.0 }
 0x12a   : > { %920 = vrot.lane.b32.xlu1 %v4095_v22, %s3786_s12  ;;  %v4171_v13 = vmax.f32 %v578_v7, 0.0  ;;  %v593_v14 = vadd.f32 %v3370_v8, %v4035_v41  ;;  %v753_v15 = vrot.slane %v4161_v6, 7  ;;  %v4176_v19 = vsel %vm827_vm1, %v846_v4, %v847_v0 }
 0x12b   : > { %v587_v17 = vpop.f32.mrf.mxu0  ;;  %v4179_v20 = vsel %vm730_vm2, %v749_v2, %v750_v62  ;;  %v4182_v21 = vsel %vm730_vm2, 0.0, %v749_v2  ;;  %v843_v2 = vrot.slane %v4130_v46, 1  ;;  %v897_v8 = vsel %vm827_vm1, %v844_v47, 0.0 }
 0x12c   : > { %v5205_v24 = vrot.slane %v4171_v13, 7  ;;  %v4186_v25 = vmax.f32 %v593_v14, 0.0  ;;  %v588_v26 = vadd.f32 %v4035_v41, %v587_v17 }
 0x12d   : > { %1032 = vrot.lane.b32.xlu0 %v839_v23, %s3787_s16  ;;  %v3373_v28 = vpop.f32.mrf.mxu0 }
 0x12e   : > { %926 = vrot.lane.b32.xlu1 %v4106_v30, %s3786_s12  ;;  %v4193_v32 = vmax.f32 %v588_v26, 0.0  ;;  %v603_v33 = vadd.f32 %v3373_v28, %v4035_v41  ;;  %v756_v36 = vrot.slane %v4186_v25, 7  ;;  %v4201_v39 = vsel %vm730_vm2, %v5205_v24, %v753_v15 }
 0x12f   : > { %v597_v37 = vpop.f32.mrf.mxu0 }
 0x130   : > { %v5206_v43 = vrot.slane %v4193_v32, 7  ;;  %v4204_v44 = vmax.f32 %v603_v33, 0.0  ;;  %v598_v30 = vadd.f32 %v4035_v41, %v597_v37 }
 0x131   : > { %1038 = vrot.lane.b32.xlu0 %v896_v31, %s3787_s16  ;;  %v3376_v45 = vpop.f32.mrf.mxu0 }
 0x132   : > { %924 = vrot.lane.b32.xlu1 %v4112_v34, %s3786_s12  ;;  %v4211_v48 = vmax.f32 %v598_v30, 0.0  ;;  %v613_v49 = vadd.f32 %v3376_v45, %v4035_v41  ;;  %v759_v55 = vrot.slane %v4204_v44, 7  ;;  %v856_v58 = vrot.slane %v4204_v44, 1 }
 0x133   : > { %v607_v57 = vpop.f32.mrf.mxu0  ;;  %v4220_v60 = vsel %vm730_vm2, %v5206_v43, %v756_v36  ;;  %v845_v45 = vsel %vm827_vm1, %v843_v2, %v844_v47 }
 0x134   : > { %v758_v61 = vrot.slane %v4211_v48, 7  ;;  %v855_v62 = vrot.slane %v4211_v48, 1  ;;  %v4224_v63 = vmax.f32 %v613_v49, 0.0  ;;  %v608_v0 = vadd.f32 %v4035_v41, %v607_v57 }
 0x135   : > { %1036 = vrot.lane.b32.xlu0 %v842_v51, %s3787_s16  ;;  %v4230_v4 = vsel %vm827_vm1, %v856_v58, 0.0  ;;  %v3379_v7 = vpop.f32.mrf.mxu0 }
 0x136   : > { %930 = vrot.lane.b32.xlu1 %v4123_v42, %s3786_s12  ;;  %v4235_v12 = vmax.f32 %v608_v0, 0.0  ;;  %v4238_v14 = vsel %vm827_vm1, %v855_v62, %v856_v58  ;;  %v623_v15 = vadd.f32 %v3379_v7, %v4035_v41  ;;  %v762_v17 = vrot.slane %v4224_v63, 7 }
 0x137   : > { %v617_v23 = vpop.f32.mrf.mxu0  ;;  %v859_v26 = vrot.slane %v4224_v63, 1  ;;  %v4244_v28 = vsel %vm730_vm2, 0.0, %v758_v61  ;;  %v4247_v31 = vsel %vm730_vm2, %v758_v61, %v759_v55 }
 0x138   : > { %5219 = vst [vmem:[#allocation9_spill] sm:$0xff] %v4244_v28  ;;  %5220 = vst [vmem:[#allocation10_spill] sm:$0xff] %v4247_v31  ;;  %v761_v42 = vrot.slane %v4235_v12, 7  ;;  %v858_v33 = vrot.slane %v4235_v12, 1  ;;  %v4251_v35 = vmax.f32 %v623_v15, 0.0  ;;  %v618_v36 = vadd.f32 %v4035_v41, %v617_v23 }
 0x139   : > { %1042 = vrot.lane.b32.xlu0 %v897_v8, %s3787_s16  ;;  %v4256_v37 = vsel %vm827_vm1, %v859_v26, 0.0  ;;  %v3382_v30 = vpop.f32.mrf.mxu0 }
 0x13a   : > { %928 = vrot.lane.b32.xlu1 %v4130_v46, %s3786_s12  ;;  %v4261_v49 = vmax.f32 %v618_v36, 0.0  ;;  %v4264_v51 = vsel %vm827_vm1, %v858_v33, %v859_v26  ;;  %v633_v55 = vadd.f32 %v3382_v30, %v4035_v41  ;;  %v765_v57 = vrot.slane %v4251_v35, 7 }
 0x13b   : > { %v627_v58 = vpop.f32.mrf.mxu0  ;;  %v862_v61 = vrot.slane %v4251_v35, 1  ;;  %v4270_v62 = vsel %vm730_vm2, %v761_v42, %v762_v17  ;;  %v4273_v0 = vsel %vm730_vm2, 0.0, %v761_v42 }
 0x13c   : > { %5221 = vst [vmem:[#allocation11_spill] sm:$0xff] %v4270_v62  ;;  %5222 = vst [vmem:[#allocation12_spill] sm:$0xff] %v4273_v0  ;;  %v764_v47 = vrot.slane %v4261_v49, 7  ;;  %v861_v2 = vrot.slane %v4261_v49, 1  ;;  %v4277_v7 = vmax.f32 %v633_v55, 0.0  ;;  %v628_v8 = vadd.f32 %v4035_v41, %v627_v58 }
 0x13d   : > { %1040 = vrot.lane.b32.xlu0 %v845_v45, %s3787_s16  ;;  %v4282_v15 = vsel %vm827_vm1, %v862_v61, 0.0  ;;  %v3385_v23 = vpop.f32.mrf.mxu0 }
 0x13e   : > { %934 = vrot.lane.b32.xlu1 %v4141_v54, %s3786_s12  ;;  %v4286_v17 = vmax.f32 %v628_v8, 0.0  ;;  %v4289_v26 = vsel %vm827_vm1, %v861_v2, %v862_v61  ;;  %v643_v42 = vadd.f32 %v3385_v23, %v4035_v41  ;;  %v768_v33 = vrot.slane %v4277_v7, 7 }
 0x13f   : > { %v637_v36 = vpop.f32.mrf.mxu0  ;;  %v865_v30 = vrot.slane %v4277_v7, 1  ;;  %v4295_v45 = vsel %vm730_vm2, %v764_v47, %v765_v57  ;;  %v4298_v55 = vsel %vm730_vm2, 0.0, %v764_v47  ;;  %v850_v2 = vrot.slane %v4161_v6, 1 }
 0x140   : > { %5223 = vst [vmem:[#allocation13_spill] sm:$0xff] %v4295_v45  ;;  %5224 = vst [vmem:[#allocation14_spill] sm:$0xff] %v4298_v55  ;;  %v767_v54 = vrot.slane %v4286_v17, 7  ;;  %v864_v58 = vrot.slane %v4286_v17, 1  ;;  %v4302_v8 = vmax.f32 %v643_v42, 0.0  ;;  %v638_v61 = vadd.f32 %v4035_v41, %v637_v36 }
 0x141   : > { %938 = vrot.lane.b32.xlu0 %v4161_v6, %s3786_s12  ;;  %v4309_v23 = vsel %vm827_vm1, %v865_v30, 0.0  ;;  %v3388_v57 = vpop.f32.mrf.mxu0 }
 0x142   : > { %932 = vrot.lane.b32.xlu1 %v4148_v59, %s3786_s12  ;;  %v4313_v47 = vmax.f32 %v638_v61, 0.0  ;;  %v4316_v24 = vsel %vm827_vm1, %v864_v58, %v865_v30  ;;  %v653_v42 = vadd.f32 %v3388_v57, %v4035_v41  ;;  %v771_v36 = vrot.slane %v4302_v8, 7 }
 0x143   : > { %v647_v43 = vpop.f32.mrf.mxu0  ;;  %v868_v53 = vrot.slane %v4302_v8, 1  ;;  %v4322_v6 = vsel %vm730_vm2, %v767_v54, %v768_v33  ;;  %v4325_v40 = vsel %vm730_vm2, 0.0, %v767_v54  ;;  %v853_v58 = vrot.slane %v4186_v25, 1 }
 0x144   : > { %5225 = vst [vmem:[#allocation15_spill] sm:$0xff] %v4322_v6  ;;  %5226 = vst [vmem:[#allocation16_spill] sm:$0xff] %v4325_v40  ;;  %v770_v59 = vrot.slane %v4313_v47, 7  ;;  %v867_v61 = vrot.slane %v4313_v47, 1  ;;  %v4329_v29 = vmax.f32 %v653_v42, 0.0  ;;  %v648_v30 = vadd.f32 %v4035_v41, %v647_v43 }
 0x145   : > { %936 = vrot.lane.b32.xlu0 %v4171_v13, %s3786_s12  ;;  %v899_v57 = vsel %vm827_vm1, %v850_v2, 0.0  ;;  %v905_v33 = vsel %vm827_vm1, %v868_v53, 0.0  ;;  %v3391_v18 = vpop.f32.mrf.mxu0  ;;  %v852_v54 = vrot.slane %v4193_v32, 1 }
 0x146   : > { %1050 = vrot.lane.b32.xlu1 %v899_v57, %s3787_s16  ;;  %v694_v9 = vmax.f32 %v648_v30, 0.0  ;;  %v869_v42 = vsel %vm827_vm1, %v867_v61, %v868_v53  ;;  %v663_v56 = vadd.f32 %v3391_v18, %v4035_v41  ;;  %v774_v43 = vrot.slane %v4329_v29, 7 }
 0x147   : > { %v657_v40 = vpop.f32.mrf.mxu0  ;;  %v871_v6 = vrot.slane %v4329_v29, 1  ;;  %v4344_v55 = vsel %vm730_vm2, %v770_v59, %v771_v36  ;;  %v4347_v45 = vsel %vm730_vm2, 0.0, %v770_v59  ;;  %v849_v53 = vrot.slane %v4171_v13, 1 }
 0x148   : > { %5227 = vst [vmem:[#allocation17_spill] sm:$0xff] %v4344_v55  ;;  %5228 = vst [vmem:[#allocation18_spill] sm:$0xff] %v4347_v45  ;;  %v773_v0 = vrot.slane %v694_v9, 7  ;;  %v870_v62 = vrot.slane %v694_v9, 1  ;;  %v697_v28 = vmax.f32 %v663_v56, 0.0  ;;  %v658_v30 = vadd.f32 %v4035_v41, %v657_v40 }
 0x149   : > { %940 = vrot.lane.b32.xlu0 %v4193_v32, %s3786_s12  ;;  %v906_v18 = vsel %vm827_vm1, %v871_v6, 0.0  ;;  %v854_v56 = vsel %vm827_vm1, %v852_v54, %v853_v58  ;;  %v900_v54 = vsel %vm827_vm1, %v853_v58, 0.0 }
 0x14a   : > { %942 = vrot.lane.b32.xlu1 %v4186_v25, %s3786_s12  ;;  %v777_v36 = vrot.slane %v697_v28, 7  ;;  %v696_v61 = vmax.f32 %v658_v30, 0.0  ;;  %v872_v59 = vsel %vm827_vm1, %v870_v62, %v871_v6  ;;  %v874_v57 = vrot.slane %v697_v28, 1 }
 0x14b   : > { %v4358_v45 = vsel %vm730_vm2, %v773_v0, %v774_v43  ;;  %v4361_v41 = vsel %vm730_vm2, 0.0, %v773_v0  ;;  %v851_v25 = vsel %vm827_vm1, %v849_v53, %v850_v2  ;;  %v5231_v43 = vrot.slane %v4078_v11, 7 }
 0x14c   : > { %v776_v40 = vrot.slane %v696_v61, 7  ;;  %v873_v55 = vrot.slane %v696_v61, 1  ;;  %v907_v31 = vsel %vm827_vm1, %v874_v57, 0.0 }
 0x14d   : > { %1052 = vrot.lane.b32.xlu0 %v854_v56, %s3787_s16 }
 0x14e   : > { %1048 = vrot.lane.b32.xlu1 %v851_v25, %s3787_s16  ;;  %v875_v62 = vsel %vm827_vm1, %v873_v55, %v874_v57  ;;  %v4370_v6 = vsel %vm730_vm2, %v776_v40, %v777_v36  ;;  %v4373_v0 = vsel %vm730_vm2, 0.0, %v776_v40  ;;  %v3061_v57 = vld [vmem:[%s5197_s2 + $0x60] sm:$0xff] }
 0x151   : > { %944 = vrot.lane.b32.xlu0 %v4211_v48, %s3786_s12  ;;  %v3066_v48 = vld [vmem:[%s5197_s2 + $0x88] sm:$0xff] }
 0x152   : > { %1054 = vrot.lane.b32.xlu1 %v900_v54, %s3787_s16  ;;  %3512 = vmatprep.subr.mxu0 %v3066_v48  ;;  %v5232_v54 = vrot.slane %v4095_v22, 7 }
 0x155   : > { %1058 = vrot.lane.b32.xlu0 %v4230_v4, %s3787_s16 }
 0x156   : > { %946 = vrot.lane.b32.xlu1 %v4204_v44, %s3786_s12  ;;  %v4402_v44 = vld [vmem:[%s5197_s2 + $0x28] sm:$0xff] }
 0x157   : > { %3452 = vmatprep.subr.mxu1 %v4402_v44 }
 0x159   : > { %1056 = vrot.lane.b32.xlu0 %v4238_v14, %s3787_s16  ;;  %v5229_v14 = vrot.slane %v4051_v52, 7 }
 0x15a   : > { %950 = vrot.lane.b32.xlu1 %v4224_v63, %s3786_s12  ;;  %v3788_v63 = vmov 0.0  }
 0x15b   : > { %1183 = vst.msk [vmem:[#allocation2] sm:$0xff] %vm1182_vm5, %v3788_v63  ;;  %1184 = vst.msk [vmem:[#allocation2 + $0x8] sm:$0xff] %vm1182_vm5, %v3788_v63 }
 0x15c   : > { %1219 = vst.msk [vmem:[#allocation2 + $0x110] sm:$0xff] %vm1182_vm5, %v3788_v63  ;;  %1220 = vst.msk [vmem:[#allocation2 + $0x118] sm:$0xff] %vm1182_vm5, %v3788_v63 }
 0x15d   : > { %1062 = vrot.lane.b32.xlu0 %v4256_v37, %s3787_s16 }
 0x15e   : > { %948 = vrot.lane.b32.xlu1 %v4235_v12, %s3786_s12 }
 0x161   : > { %1060 = vrot.lane.b32.xlu0 %v4264_v51, %s3787_s16 }
 0x162   : > { %954 = vrot.lane.b32.xlu1 %v4251_v35, %s3786_s12 }
 0x165   : > { %1066 = vrot.lane.b32.xlu0 %v4282_v15, %s3787_s16  ;;  %v5230_v15 = vrot.slane %v4066_v3, 7  ;;  %v3065_v3 = vld [vmem:[%s5197_s2 + $0x80] sm:$0xff] }
 0x166   : > { %952 = vrot.lane.b32.xlu1 %v4261_v49, %s3786_s12 }
 0x169   : > { %1064 = vrot.lane.b32.xlu0 %v4289_v26, %s3787_s16 }
 0x16a   : > { %958 = vrot.lane.b32.xlu1 %v4277_v7, %s3786_s12 }
 0x16d   : > { %1070 = vrot.lane.b32.xlu0 %v4309_v23, %s3787_s16 }
 0x16e   : > { %956 = vrot.lane.b32.xlu1 %v4286_v17, %s3786_s12  ;;  %v812_v17 = vsel %vm730_vm2, 0.0, %v5230_v15 }
 0x171   : > { %1068 = vrot.lane.b32.xlu0 %v4316_v24, %s3787_s16 }
 0x172   : > { %962 = vrot.lane.b32.xlu1 %v4302_v8, %s3786_s12 }
 0x175   : > { %1074 = vrot.lane.b32.xlu0 %v905_v33, %s3787_s16 }
 0x176   : > { %960 = vrot.lane.b32.xlu1 %v4313_v47, %s3786_s12  ;;  %v3064_v47 = vld [vmem:[%s5197_s2 + $0x78] sm:$0xff] }
 0x179   : > { %1072 = vrot.lane.b32.xlu0 %v869_v42, %s3787_s16  ;;  %v3063_v42 = vld [vmem:[%s5197_s2 + $0x70] sm:$0xff] }
 0x17a   : > { %966 = vrot.lane.b32.xlu1 %v4329_v29, %s3786_s12 }
 0x17d   : > { %1078 = vrot.lane.b32.xlu0 %v906_v18, %s3787_s16  ;;  %v3062_v18 = vld [vmem:[%s5197_s2 + $0x68] sm:$0xff] }
 0x17e   : > { %964 = vrot.lane.b32.xlu1 %v694_v9, %s3786_s12 }
 0x180   : > { %v911_v24 = vpop.permute.xlu1 %910 }
 0x181   : > { %1076 = vrot.lane.b32.xlu0 %v872_v59, %s3787_s16  ;;  %v1118_v9 = vsel %vm1116_vm3, %v4071_v5, %v911_v24 }
 0x182   : > { %970 = vrot.lane.b32.xlu1 %v697_v28, %s3786_s12  ;;  %v811_v28 = vsel %vm730_vm2, 0.0, %v5229_v14 }
 0x183   : > { %v1023_v29 = vpop.permute.xlu0 %1022 }
 0x184   : > { %v1151_v4 = vsel %vm1149_vm4, %v1118_v9, %v1023_v29  ;;  %v909_v12 = vpop.permute.xlu1 %908 }
 0x185   : > { %1187 = vst.msk [vmem:[#allocation2 + $0x18] sm:$0xff] %vm1182_vm5, %v1151_v4  ;;  %1082 = vrot.lane.b32.xlu0 %v907_v31, %s3787_s16  ;;  %v1117_v35 = vsel %vm1116_vm3, %v811_v28, %v909_v12 }
 0x186   : > { %968 = vrot.lane.b32.xlu1 %v696_v61, %s3786_s12 }
 0x187   : > { %v1021_v37 = vpop.permute.xlu0 %1020 }
 0x188   : > { %v1150_v49 = vsel %vm1149_vm4, %v1117_v35, %v1021_v37  ;;  %v915_v5 = vpop.permute.xlu1 %914  ;;  %v5233_v35 = vrot.slane %v4112_v34, 7 }
 0x189   : > { %1186 = vst.msk [vmem:[#allocation2 + $0x10] sm:$0xff] %vm1182_vm5, %v1150_v49  ;;  %1080 = vrot.lane.b32.xlu0 %v875_v62, %s3787_s16  ;;  %v1120_v52 = vsel %vm1116_vm3, %v4085_v16, %v915_v5 }
 0x18a   : > { %1046 = vrot.lane.b32.xlu1 %v4166_v10, %s3787_s16  ;;  %v815_v37 = vsel %vm730_vm2, 0.0, %v5233_v35 }
 0x18b   : > { %v1027_v31 = vpop.permute.xlu0 %1026 }
 0x18c   : > { %v1153_v51 = vsel %vm1149_vm4, %v1120_v52, %v1027_v31  ;;  %v913_v7 = vpop.permute.xlu1 %912  ;;  %v4465_v2 = vld [vmem:[#allocation2 + $0x18] sm:$0xff] }
 0x18d   : > { %1189 = vst.msk [vmem:[#allocation2 + $0x28] sm:$0xff] %vm1182_vm5, %v1153_v51  ;;  %1044 = vrot.lane.b32.xlu0 %v4176_v19, %s3787_s16  ;;  %v1119_v26 = vsel %vm1116_vm3, %v812_v17, %v913_v7  ;;  %s5022_s16 = scalar_lea.vmem [#allocation6], %s2956_s11  ;;  %s3139_s11 = sshll.u32 %s3853_s28, 12 }
 0x18e   : > { %s2876_s18 = sshll.u32 %s5022_s16, 4  ;;  %s5146_s23 = scalar_lea.hbm %s5202_s7, %s3139_s11  ;;  %s5148_s18 = int_to_ptr.vmem [resolvable:$true] %s2876_s18 }
 0x18f   : > { %v1025_v55 = vpop.permute.xlu0 %1024  ;;  %s2863_s28 = scalar_lea.sflag [#allocation5], %s3929_s17  ;;  %p3724_p5 = scmp.lt.s32.totalorder %s5148_s18, %s3722_s19 }
 0x190   : > { %v1152_v10 = vsel %vm1149_vm4, %v1119_v26, %v1025_v55  ;;  %v919_v8 = vpop.permute.xlu1 %918  ;;  %v4460_v16 = vld [vmem:[#allocation2 + $0x10] sm:$0xff]  ;;  %v5234_v26 = vrot.slane %v4130_v46, 7 }
 0x191   : > { %1188 = vst.msk [vmem:[#allocation2 + $0x20] sm:$0xff] %vm1182_vm5, %v1152_v10  ;;  %3404 = vmatprep.mubr.msk.f32.mxu0 %vm1182_vm5, %v4460_v16  ;;  %v1122_v19 = vsel %vm1116_vm3, %v4102_v27, %v919_v8  ;;  %v813_v27 = vsel %vm730_vm2, 0.0, %v5231_v43 }
 0x192   : > { %3405 = vmatmul.mubr.msk.f32.vlgmr.msra.gmra.mxu0 %vm1182_vm5, %v4465_v2  ;;  %v816_v55 = vsel %vm730_vm2, 0.0, %v5234_v26  ;;  %v5239_v26 = vld [vmem:[#allocation11_spill] sm:$0xff] }
 0x193   : > { %v1031_v23 = vpop.permute.xlu0 %1030  ;;  %3513 = vmatpush3.msra.mxu0 %v3066_v48  ;;  %v814_v48 = vsel %vm730_vm2, 0.0, %v5232_v54 }
 0x194   : > { %v1155_v58 = vsel %vm1149_vm4, %v1122_v19, %v1031_v23  ;;  %v917_v33 = vpop.permute.xlu1 %916  ;;  %3514 = vmatprep.subr.mxu0 %v3065_v3  ;;  %v4495_v11 = vld [vmem:[#allocation2 + $0x28] sm:$0xff] }
 0x195   : > { %1191 = vst.msk [vmem:[#allocation2 + $0x38] sm:$0xff] %vm1182_vm5, %v1155_v58  ;;  %3515 = vmatpush3.msra.mxu0 %v3065_v3  ;;  %v1121_v30 = vsel %vm1116_vm3, %v813_v27, %v917_v33 }
 0x196   : > { %3516 = vmatprep.subr.mxu0 %v3064_v47 }
 0x197   : > { %v1029_v53 = vpop.permute.xlu0 %1028  ;;  %3517 = vmatpush3.msra.mxu0 %v3064_v47 }
 0x198   : > { %v1154_v36 = vsel %vm1149_vm4, %v1121_v30, %v1029_v53  ;;  %v923_v61 = vpop.permute.xlu1 %922  ;;  %v4490_v59 = vld [vmem:[#allocation2 + $0x20] sm:$0xff]  ;;  %3518 = vmatprep.subr.mxu0 %v3063_v42 }
 0x199   : > { %1190 = vst.msk [vmem:[#allocation2 + $0x30] sm:$0xff] %vm1182_vm5, %v1154_v36  ;;  %3407 = vmatprep.mubr.msk.f32.mxu0 %vm1182_vm5, %v4490_v59  ;;  %3519 = vmatpush3.msra.mxu0 %v3063_v42  ;;  %v1124_v56 = vsel %vm1116_vm3, %v4119_v38, %v923_v61  ;;  %v5235_v36 = vrot.slane %v4193_v32, 7  ;;  %v5236_v61 = vrot.slane %v4171_v13, 7 }
 0x19a   : > { %3408 = vmatmul.mubr.msk.f32.gmra.mxu0 %vm1182_vm5, %v4495_v11  ;;  %3520 = vmatprep.subr.mxu0 %v3062_v18 }
 0x19b   : > { %v1035_v40 = vpop.permute.xlu0 %1034  ;;  %3521 = vmatpush3.msra.mxu0 %v3062_v18 }
 0x19c   : > { %v1157_v25 = vsel %vm1149_vm4, %v1124_v56, %v1035_v40  ;;  %v921_v62 = vpop.permute.xlu1 %920  ;;  %3522 = vmatprep.subr.mxu0 %v3061_v57  ;;  %v4516_v4 = vld [vmem:[#allocation2 + $0x38] sm:$0xff] }
 0x19d   : > { %1193 = vst.msk [vmem:[#allocation2 + $0x48] sm:$0xff] %vm1182_vm5, %v1157_v25  ;;  %3523 = vmatpush3.msra.mxu0 %v3061_v57  ;;  %v1123_v24 = vsel %vm1116_vm3, %v814_v48, %v921_v62  ;;  %v818_v57 = vsel %vm730_vm2, 0.0, %v5236_v61 }
 0x19f   : > { %v1033_v63 = vpop.permute.xlu0 %1032 }
 0x1a0   : > { %v1156_v9 = vsel %vm1149_vm4, %v1123_v24, %v1033_v63  ;;  %v927_v29 = vpop.permute.xlu1 %926  ;;  %v4511_v38 = vld [vmem:[#allocation2 + $0x30] sm:$0xff] }
 0x1a1   : > { %1192 = vst.msk [vmem:[#allocation2 + $0x40] sm:$0xff] %vm1182_vm5, %v1156_v9  ;;  %3410 = vmatprep.mubr.msk.f32.mxu0 %vm1182_vm5, %v4511_v38  ;;  %v1126_v22 = vsel %vm1116_vm3, %v4137_v50, %v927_v29 }
 0x1a2   : > { %3411 = vmatmul.mubr.msk.f32.gmra.mxu0 %vm1182_vm5, %v4516_v4 }
 0x1a3   : > { %v1039_v12 = vpop.permute.xlu0 %1038 }
 0x1a4   : > { %v1159_v14 = vsel %vm1149_vm4, %v1126_v22, %v1039_v12  ;;  %v925_v28 = vpop.permute.xlu1 %924  ;;  %v4534_v50 = vld [vmem:[#allocation2 + $0x48] sm:$0xff] }
 0x1a5   : > { %1195 = vst.msk [vmem:[#allocation2 + $0x58] sm:$0xff] %vm1182_vm5, %v1159_v14  ;;  %v1125_v49 = vsel %vm1116_vm3, %v815_v37, %v925_v28  ;;  %v5237_v22 = vld [vmem:[#allocation10_spill] sm:$0xff]  ;;  %v5238_v37 = vld [vmem:[#allocation9_spill] sm:$0xff] }
 0x1a7   : > { %v1037_v5 = vpop.permute.xlu0 %1036 }
 0x1a8   : > { %v1158_v52 = vsel %vm1149_vm4, %v1125_v49, %v1037_v5  ;;  %v931_v31 = vpop.permute.xlu1 %930  ;;  %v4529_v51 = vld [vmem:[#allocation2 + $0x40] sm:$0xff] }
 0x1a9   : > { %1194 = vst.msk [vmem:[#allocation2 + $0x50] sm:$0xff] %vm1182_vm5, %v1158_v52  ;;  %3413 = vmatprep.mubr.msk.f32.mxu0 %vm1182_vm5, %v4529_v51  ;;  %v1128_v34 = vsel %vm1116_vm3, %v4157_v1, %v931_v31 }
 0x1aa   : > { %3414 = vmatmul.mubr.msk.f32.gmra.mxu0 %vm1182_vm5, %v4534_v50 }
 0x1ab   : > { %v1043_v7 = vpop.permute.xlu0 %1042 }
 0x1ac   : > { %v1161_v15 = vsel %vm1149_vm4, %v1128_v34, %v1043_v7  ;;  %v929_v17 = vpop.permute.xlu1 %928  ;;  %v4556_v46 = vld [vmem:[#allocation2 + $0x58] sm:$0xff] }
 0x1ad   : > { %1197 = vst.msk [vmem:[#allocation2 + $0x68] sm:$0xff] %vm1182_vm5, %v1161_v15  ;;  %v1127_v10 = vsel %vm1116_vm3, %v816_v55, %v929_v17  ;;  %v1256_v7 = vld [vmem:[%s5197_s2 + $0x18] sm:$0xff]  ;;  %v1255_v17 = vld [vmem:[%s5197_s2 + $0x10] sm:$0xff] }
 0x1af   : > { %v1041_v8 = vpop.permute.xlu0 %1040 }
 0x1b0   : > { %v1160_v3 = vsel %vm1149_vm4, %v1127_v10, %v1041_v8  ;;  %v935_v19 = vpop.permute.xlu1 %934  ;;  %v4547_v23 = vld [vmem:[#allocation2 + $0x50] sm:$0xff] }
 0x1b1   : > { %1196 = vst.msk [vmem:[#allocation2 + $0x60] sm:$0xff] %vm1182_vm5, %v1160_v3  ;;  %v4552_v1 = vsel %vm1116_vm3, %v4179_v20, %v935_v19  ;;  %3416 = vmatprep.mubr.msk.f32.mxu0 %vm1182_vm5, %v4547_v23  ;;  %v1254_v3 = vld [vmem:[%s5197_s2 + $0x8] sm:$0xff]  ;;  %v1253_v19 = vld [vmem:[%s5197_s2] sm:$0xff] }
 0x1b2   : > { %3417 = vmatmul.mubr.msk.f32.gmra.mxu0 %vm1182_vm5, %v4556_v46 }
 0x1b3   : > { %v939_v47 = vpop.permute.xlu0 %938 }
 0x1b4   : > { %v933_v58 = vpop.permute.xlu1 %932  ;;  %v1132_v43 = vsel %vm1116_vm3, %v4201_v39, %v939_v47  ;;  %v4571_v53 = vld [vmem:[#allocation2 + $0x68] sm:$0xff]  ;;  %v819_v39 = vsel %vm730_vm2, 0.0, %v5235_v36  ;;  %v5240_v47 = vld [vmem:[#allocation12_spill] sm:$0xff] }
 0x1b5   : > { %v4562_v33 = vsel %vm1116_vm3, %v4182_v21, %v933_v58 }
 0x1b7   : > { %v937_v42 = vpop.permute.xlu0 %936 }
 0x1b8   : > { %v1051_v20 = vpop.permute.xlu1 %1050  ;;  %v4566_v27 = vld [vmem:[#allocation2 + $0x60] sm:$0xff]  ;;  %v1131_v25 = vsel %vm1116_vm3, %v818_v57, %v937_v42 }
 0x1b9   : > { %v1165_v30 = vsel %vm1149_vm4, %v1132_v43, %v1051_v20  ;;  %3419 = vmatprep.mubr.msk.f32.mxu0 %vm1182_vm5, %v4566_v27 }
 0x1ba   : > { %1201 = vst.msk [vmem:[#allocation2 + $0x88] sm:$0xff] %vm1182_vm5, %v1165_v30  ;;  %3420 = vmatmul.mubr.msk.f32.gmra.mxu0 %vm1182_vm5, %v4571_v53 }
 0x1bb   : > { %v941_v21 = vpop.permute.xlu0 %940 }
 0x1bc   : > { %v943_v18 = vpop.permute.xlu1 %942  ;;  %v1133_v56 = vsel %vm1116_vm3, %v819_v39, %v941_v21 }
 0x1bd   : > { %v1134_v13 = vsel %vm1116_vm3, %v4220_v60, %v943_v18  ;;  %v1257_v60 = vld [vmem:[%s5197_s2 + $0x20] sm:$0xff] }
 0x1be   : > { %v5241_v18 = vld [vmem:[#allocation13_spill] sm:$0xff] }
 0x1bf   : > { %v1053_v40 = vpop.permute.xlu0 %1052 }
 0x1c0   : > { %v1166_v62 = vsel %vm1149_vm4, %v1133_v56, %v1053_v40  ;;  %v1049_v54 = vpop.permute.xlu1 %1048  ;;  %v5242_v56 = vld [vmem:[#allocation14_spill] sm:$0xff] }
 0x1c1   : > { %1202 = vst.msk [vmem:[#allocation2 + $0x90] sm:$0xff] %vm1182_vm5, %v1166_v62  ;;  %v1164_v48 = vsel %vm1149_vm4, %v1131_v25, %v1049_v54  ;;  %v4599_v35 = vld [vmem:[#allocation2 + $0x88] sm:$0xff] }
 0x1c2   : > { %1200 = vst.msk [vmem:[#allocation2 + $0x80] sm:$0xff] %vm1182_vm5, %v1164_v48 }
 0x1c3   : > { %v945_v32 = vpop.permute.xlu0 %944 }
 0x1c4   : > { %v1055_v24 = vpop.permute.xlu1 %1054  ;;  %v1135_v49 = vsel %vm1116_vm3, %v5238_v37, %v945_v32 }
 0x1c5   : > { %v1167_v63 = vsel %vm1149_vm4, %v1134_v13, %v1055_v24  ;;  %v5243_v13 = vld [vmem:[#allocation15_spill] sm:$0xff] }
 0x1c6   : > { %1203 = vst.msk [vmem:[#allocation2 + $0x98] sm:$0xff] %vm1182_vm5, %v1167_v63 }
 0x1c7   : > { %v1059_v9 = vpop.permute.xlu0 %1058 }
 0x1c8   : > { %v947_v29 = vpop.permute.xlu1 %946  ;;  %v4609_v52 = vld [vmem:[#allocation2 + $0x90] sm:$0xff] }
 0x1c9   : > { %v1136_v12 = vsel %vm1116_vm3, %v5237_v22, %v947_v29  ;;  %v4594_v14 = vld [vmem:[#allocation2 + $0x80] sm:$0xff]  ;;  %v5244_v22 = vld [vmem:[#allocation16_spill] sm:$0xff] }
 0x1ca   : > { %v1169_v28 = vsel %vm1149_vm4, %v1136_v12, %v1059_v9  ;;  %3425 = vmatprep.mubr.msk.f32.mxu1 %vm1182_vm5, %v4594_v14 }
 0x1cb   : > { %1205 = vst.msk [vmem:[#allocation2 + $0xa8] sm:$0xff] %vm1182_vm5, %v1169_v28  ;;  %3426 = vmatmul.mubr.msk.f32.vlgmr.msra.gmra.mxu1 %vm1182_vm5, %v4599_v35  ;;  %v1057_v5 = vpop.permute.xlu0 %1056 }
 0x1cc   : > { %v1168_v31 = vsel %vm1149_vm4, %v1135_v49, %v1057_v5  ;;  %v951_v34 = vpop.permute.xlu1 %950  ;;  %3428 = vmatprep.mubr.msk.f32.mxu1 %vm1182_vm5, %v4609_v52  ;;  %3453 = vmatpush3.msra.mxu1 %v4402_v44 }
 0x1cd   : > { %1204 = vst.msk [vmem:[#allocation2 + $0xa0] sm:$0xff] %vm1182_vm5, %v1168_v31  ;;  %v4619_v15 = vld [vmem:[#allocation2 + $0x98] sm:$0xff]  ;;  %3454 = vmatprep.subr.mxu1 %v1257_v60  ;;  %v1138_v55 = vsel %vm1116_vm3, %v5239_v26, %v951_v34  ;;  %v5245_v31 = vld [vmem:[#allocation17_spill] sm:$0xff] }
 0x1ce   : > { %3455 = vmatpush3.msra.mxu1 %v1257_v60 }
 0x1cf   : > { %3429 = vmatmul.mubr.msk.f32.gmra.mxu1 %vm1182_vm5, %v4619_v15  ;;  %v1063_v44 = vpop.permute.xlu0 %1062  ;;  %3456 = vmatprep.subr.mxu1 %v1256_v7 }
 0x1d0   : > { %v1171_v10 = vsel %vm1149_vm4, %v1138_v55, %v1063_v44  ;;  %v949_v8 = vpop.permute.xlu1 %948  ;;  %3457 = vmatpush3.msra.mxu1 %v1256_v7  ;;  %v5246_v55 = vld [vmem:[#allocation18_spill] sm:$0xff] }
 0x1d1   : > { %1207 = vst.msk [vmem:[#allocation2 + $0xb8] sm:$0xff] %vm1182_vm5, %v1171_v10  ;;  %3458 = vmatprep.subr.mxu1 %v1255_v17  ;;  %v1137_v58 = vsel %vm1116_vm3, %v5240_v47, %v949_v8 }
 0x1d2   : > { %3459 = vmatpush3.msra.mxu1 %v1255_v17  ;;  %v4644_v21 = vld [vmem:[#allocation2 + $0xa8] sm:$0xff] }
 0x1d3   : > { %v1061_v42 = vpop.permute.xlu0 %1060  ;;  %3460 = vmatprep.subr.mxu1 %v1254_v3 }
 0x1d4   : > { %v1170_v43 = vsel %vm1149_vm4, %v1137_v58, %v1061_v42  ;;  %v955_v20 = vpop.permute.xlu1 %954  ;;  %v4639_v30 = vld [vmem:[#allocation2 + $0xa0] sm:$0xff]  ;;  %3461 = vmatpush3.msra.mxu1 %v1254_v3 }
 0x1d5   : > { %1206 = vst.msk [vmem:[#allocation2 + $0xb0] sm:$0xff] %vm1182_vm5, %v1170_v43  ;;  %3431 = vmatprep.mubr.msk.f32.mxu1 %vm1182_vm5, %v4639_v30  ;;  %3462 = vmatprep.subr.mxu1 %v1253_v19  ;;  %v1140_v36 = vsel %vm1116_vm3, %v5241_v18, %v955_v20 }
 0x1d6   : > { %3432 = vmatmul.mubr.msk.f32.gmra.mxu1 %vm1182_vm5, %v4644_v21 }
 0x1d7   : > { %v1067_v39 = vpop.permute.xlu0 %1066  ;;  %3463 = vmatpush3.msra.mxu1 %v1253_v19 }
 0x1d8   : > { %v1173_v61 = vsel %vm1149_vm4, %v1140_v36, %v1067_v39  ;;  %v953_v57 = vpop.permute.xlu1 %952  ;;  %v4660_v32 = vld [vmem:[#allocation2 + $0xb8] sm:$0xff] }
 0x1d9   : > { %1209 = vst.msk [vmem:[#allocation2 + $0xc8] sm:$0xff] %vm1182_vm5, %v1173_v61  ;;  %v1139_v40 = vsel %vm1116_vm3, %v5242_v56, %v953_v57 }
 0x1db   : > { %v1065_v25 = vpop.permute.xlu0 %1064 }
 0x1dc   : > { %v1172_v62 = vsel %vm1149_vm4, %v1139_v40, %v1065_v25  ;;  %v959_v54 = vpop.permute.xlu1 %958  ;;  %v4655_v48 = vld [vmem:[#allocation2 + $0xb0] sm:$0xff] }
 0x1dd   : > { %1208 = vst.msk [vmem:[#allocation2 + $0xc0] sm:$0xff] %vm1182_vm5, %v1172_v62  ;;  %3434 = vmatprep.mubr.msk.f32.mxu1 %vm1182_vm5, %v4655_v48  ;;  %v1142_v24 = vsel %vm1116_vm3, %v5243_v13, %v959_v54 }
 0x1de   : > { %3435 = vmatmul.mubr.msk.f32.gmra.mxu1 %vm1182_vm5, %v4660_v32 }
 0x1df   : > { %v1071_v63 = vpop.permute.xlu0 %1070 }
 0x1e0   : > { %v1175_v9 = vsel %vm1149_vm4, %v1142_v24, %v1071_v63  ;;  %v957_v29 = vpop.permute.xlu1 %956  ;;  %v4676_v5 = vld [vmem:[#allocation2 + $0xc8] sm:$0xff] }
 0x1e1   : > { %1211 = vst.msk [vmem:[#allocation2 + $0xd8] sm:$0xff] %vm1182_vm5, %v1175_v9  ;;  %v1141_v12 = vsel %vm1116_vm3, %v5244_v22, %v957_v29 }
 0x1e3   : > { %v1069_v28 = vpop.permute.xlu0 %1068 }
 0x1e4   : > { %v1174_v60 = vsel %vm1149_vm4, %v1141_v12, %v1069_v28  ;;  %v963_v37 = vpop.permute.xlu1 %962  ;;  %v4671_v49 = vld [vmem:[#allocation2 + $0xc0] sm:$0xff]  ;;  %v1222_v28 = vld [vmem:[#allocation2 + $0x8] sm:$0xff] }
 0x1e5   : > { %1210 = vst.msk [vmem:[#allocation2 + $0xd0] sm:$0xff] %vm1182_vm5, %v1174_v60  ;;  %3437 = vmatprep.mubr.msk.f32.mxu1 %vm1182_vm5, %v4671_v49  ;;  %v1144_v34 = vsel %vm1116_vm3, %v5245_v31, %v963_v37  ;;  %v1221_v12 = vld [vmem:[#allocation2] sm:$0xff] }
 0x1e6   : > { %3438 = vmatmul.mubr.msk.f32.gmra.mxu1 %vm1182_vm5, %v4676_v5 }
 0x1e7   : > { %v1075_v7 = vpop.permute.xlu0 %1074 }
 0x1e8   : > { %v1177_v17 = vsel %vm1149_vm4, %v1144_v34, %v1075_v7  ;;  %v961_v26 = vpop.permute.xlu1 %960  ;;  %v4692_v47 = vld [vmem:[#allocation2 + $0xd8] sm:$0xff] }
 0x1e9   : > { %1213 = vst.msk [vmem:[#allocation2 + $0xe8] sm:$0xff] %vm1182_vm5, %v1177_v17  ;;  %v1143_v44 = vsel %vm1116_vm3, %v5246_v55, %v961_v26 }
 0x1eb   : > { %v1073_v10 = vpop.permute.xlu0 %1072 }
 0x1ec   : > { %v1176_v8 = vsel %vm1149_vm4, %v1143_v44, %v1073_v10  ;;  %v967_v3 = vpop.permute.xlu1 %966  ;;  %v4687_v19 = vld [vmem:[#allocation2 + $0xd0] sm:$0xff] }
 0x1ed   : > { %1212 = vst.msk [vmem:[#allocation2 + $0xe0] sm:$0xff] %vm1182_vm5, %v1176_v8  ;;  %3440 = vmatprep.mubr.msk.f32.mxu1 %vm1182_vm5, %v4687_v19  ;;  %v1146_v58 = vsel %vm1116_vm3, %v4358_v45, %v967_v3 }
 0x1ee   : > { %3441 = vmatmul.mubr.msk.f32.gmra.mxu1 %vm1182_vm5, %v4692_v47 }
 0x1ef   : > { %v1079_v42 = vpop.permute.xlu0 %1078 }
 0x1f0   : > { %v1179_v43 = vsel %vm1149_vm4, %v1146_v58, %v1079_v42  ;;  %v965_v20 = vpop.permute.xlu1 %964  ;;  %v4708_v45 = vld [vmem:[#allocation2 + $0xe8] sm:$0xff] }
 0x1f1   : > { %1215 = vst.msk [vmem:[#allocation2 + $0xf8] sm:$0xff] %vm1182_vm5, %v1179_v43  ;;  %v1145_v18 = vsel %vm1116_vm3, %v4361_v41, %v965_v20 }
 0x1f3   : > { %v1077_v36 = vpop.permute.xlu0 %1076 }
 0x1f4   : > { %v1178_v39 = vsel %vm1149_vm4, %v1145_v18, %v1077_v36  ;;  %v971_v61 = vpop.permute.xlu1 %970  ;;  %v4703_v57 = vld [vmem:[#allocation2 + $0xe0] sm:$0xff] }
 0x1f5   : > { %1214 = vst.msk [vmem:[#allocation2 + $0xf0] sm:$0xff] %vm1182_vm5, %v1178_v39  ;;  %3443 = vmatprep.mubr.msk.f32.mxu1 %vm1182_vm5, %v4703_v57  ;;  %v1148_v56 = vsel %vm1116_vm3, %v4370_v6, %v971_v61 }
 0x1f6   : > { %3444 = vmatmul.mubr.msk.f32.gmra.mxu1 %vm1182_vm5, %v4708_v45 }
 0x1f7   : > { %v1083_v41 = vpop.permute.xlu0 %1082 }
 0x1f8   : > { %v1181_v40 = vsel %vm1149_vm4, %v1148_v56, %v1083_v41  ;;  %v969_v25 = vpop.permute.xlu1 %968  ;;  %v4726_v9 = vld [vmem:[#allocation2 + $0xf8] sm:$0xff] }
 0x1f9   : > { %1217 = vst.msk [vmem:[#allocation2 + $0x108] sm:$0xff] %vm1182_vm5, %v1181_v40  ;;  %v1147_v62 = vsel %vm1116_vm3, %v4373_v0, %v969_v25 }
 0x1fb   : > { %v1081_v54 = vpop.permute.xlu0 %1080 }
 0x1fc   : > { %v1180_v13 = vsel %vm1149_vm4, %v1147_v62, %v1081_v54  ;;  %v1047_v24 = vpop.permute.xlu1 %1046  ;;  %v4719_v63 = vld [vmem:[#allocation2 + $0xf0] sm:$0xff] }
 0x1fd   : > { %1216 = vst.msk [vmem:[#allocation2 + $0x100] sm:$0xff] %vm1182_vm5, %v1180_v13  ;;  %v1163_v6 = vsel %vm1149_vm4, %v4552_v1, %v1047_v24  ;;  %3446 = vmatprep.mubr.msk.f32.mxu1 %vm1182_vm5, %v4719_v63 }
 0x1fe   : > { %1199 = vst.msk [vmem:[#allocation2 + $0x78] sm:$0xff] %vm1182_vm5, %v1163_v6  ;;  %3447 = vmatmul.mubr.msk.f32.gmra.mxu1 %vm1182_vm5, %v4726_v9 }
 0x1ff   : > { %v1045_v0 = vpop.permute.xlu0 %1044 }
 0x200   : > { %v1162_v29 = vsel %vm1149_vm4, %v4562_v33, %v1045_v0  ;;  %v4738_v1 = vld [vmem:[#allocation2 + $0x108] sm:$0xff] }
 0x201   : > { %1198 = vst.msk [vmem:[#allocation2 + $0x70] sm:$0xff] %vm1182_vm5, %v1162_v29 }
 0x204   : > { %v4734_v22 = vld [vmem:[#allocation2 + $0x100] sm:$0xff] }
 0x205   : > { %3449 = vmatprep.mubr.msk.f32.mxu1 %vm1182_vm5, %v4734_v22  ;;  %v1272_v33 = vld [vmem:[#allocation2 + $0x78] sm:$0xff] }
 0x206   : > { %3450 = vmatmul.mubr.msk.f32.gmra.mxu1 %vm1182_vm5, %v4738_v1 }
 0x207   : > { %3464 = vmatprep.mubr.msk.f32.mxu1 %vm1182_vm5, %v1221_v12 }
 0x208   : > { %v1271_v60 = vld [vmem:[#allocation2 + $0x70] sm:$0xff] }
 0x209   : > { %3422 = vmatprep.mubr.msk.f32.mxu0 %vm1182_vm5, %v1271_v60 }
 0x20a   : > { %3423 = vmatmul.mubr.msk.f32.gmra.mxu0 %vm1182_vm5, %v1272_v33  ;;  %3465 = vmatmul.mubr.msk.f32.vlgmr.msra.gmra.mxu1 %vm1182_vm5, %v1222_v28 }
 0x20b   : > { %3467 = vmatprep.mubr.msk.f32.mxu1 %vm1182_vm5, %v4460_v16  ;;  %3524 = vmatprep.mubr.msk.f32.mxu0 %vm1182_vm5, %v4490_v59  ;;  %v2405_v16 = vld [vmem:[%s5198_s3 + $0x8] sm:$0xff] }
 0x20c   : > { %3572 = vmatprep.subr.mxu1 %v2405_v16 }
 0x20d   : > { %3573 = vmatpush3.msra.mxu1 %v2405_v16 }
 0x20e   : > { %3468 = vmatmul.mubr.msk.f32.gmra.mxu1 %vm1182_vm5, %v4465_v2  ;;  %3525 = vmatmul.mubr.msk.f32.vlgmr.msra.gmra.mxu0 %vm1182_vm5, %v4495_v11  ;;  %v2404_v2 = vld [vmem:[%s5198_s3] sm:$0xff] }
 0x20f   : > { %3470 = vmatprep.mubr.msk.f32.mxu1 %vm1182_vm5, %v4490_v59  ;;  %3527 = vmatprep.mubr.msk.f32.mxu0 %vm1182_vm5, %v4511_v38  ;;  %v1971_v59 = vld [vmem:[#allocation2 + $0x110] sm:$0xff] }
 0x210   : > { %3574 = vmatprep.subr.mxu1 %v2404_v2 }
 0x211   : > { %3575 = vmatpush3.msra.mxu1 %v2404_v2 }
 0x212   : > { %3471 = vmatmul.mubr.msk.f32.gmra.mxu1 %vm1182_vm5, %v4495_v11  ;;  %3528 = vmatmul.mubr.msk.f32.gmra.mxu0 %vm1182_vm5, %v4516_v4  ;;  %v1972_v11 = vld [vmem:[#allocation2 + $0x118] sm:$0xff] }
 0x213   : > { %3473 = vmatprep.mubr.msk.f32.mxu1 %vm1182_vm5, %v4511_v38  ;;  %3530 = vmatprep.mubr.msk.f32.mxu0 %vm1182_vm5, %v4529_v51 }
 0x216   : > { %3474 = vmatmul.mubr.msk.f32.gmra.mxu1 %vm1182_vm5, %v4516_v4  ;;  %3531 = vmatmul.mubr.msk.f32.gmra.mxu0 %vm1182_vm5, %v4534_v50 }
 0x217   : > { %3476 = vmatprep.mubr.msk.f32.mxu1 %vm1182_vm5, %v4529_v51  ;;  %3533 = vmatprep.mubr.msk.f32.mxu0 %vm1182_vm5, %v4547_v23 }
 0x21a   : > { %3477 = vmatmul.mubr.msk.f32.gmra.mxu1 %vm1182_vm5, %v4534_v50  ;;  %3534 = vmatmul.mubr.msk.f32.gmra.mxu0 %vm1182_vm5, %v4556_v46 }
 0x21b   : > { %3479 = vmatprep.mubr.msk.f32.mxu1 %vm1182_vm5, %v4547_v23  ;;  %3536 = vmatprep.mubr.msk.f32.mxu0 %vm1182_vm5, %v4566_v27 }
 0x21e   : > { %3480 = vmatmul.mubr.msk.f32.gmra.mxu1 %vm1182_vm5, %v4556_v46  ;;  %3537 = vmatmul.mubr.msk.f32.gmra.mxu0 %vm1182_vm5, %v4571_v53 }
 0x21f   : > { %3482 = vmatprep.mubr.msk.f32.mxu1 %vm1182_vm5, %v4566_v27  ;;  %3539 = vmatprep.mubr.msk.f32.mxu0 %vm1182_vm5, %v1271_v60 }
 0x222   : > { %3483 = vmatmul.mubr.msk.f32.gmra.mxu1 %vm1182_vm5, %v4571_v53  ;;  %3540 = vmatmul.mubr.msk.f32.gmra.mxu0 %vm1182_vm5, %v1272_v33 }
 0x223   : > { %3485 = vmatprep.mubr.msk.f32.mxu1 %vm1182_vm5, %v1271_v60  ;;  %3542 = vmatprep.mubr.msk.f32.mxu0 %vm1182_vm5, %v4594_v14 }
 0x226   : > { %3486 = vmatmul.mubr.msk.f32.gmra.mxu1 %vm1182_vm5, %v1272_v33  ;;  %3543 = vmatmul.mubr.msk.f32.gmra.mxu0 %vm1182_vm5, %v4599_v35 }
 0x227   : > { %3488 = vmatprep.mubr.msk.f32.mxu1 %vm1182_vm5, %v4594_v14  ;;  %3545 = vmatprep.mubr.msk.f32.mxu0 %vm1182_vm5, %v4609_v52 }
 0x22a   : > { %3489 = vmatmul.mubr.msk.f32.gmra.mxu1 %vm1182_vm5, %v4599_v35  ;;  %3546 = vmatmul.mubr.msk.f32.gmra.mxu0 %vm1182_vm5, %v4619_v15 }
 0x22b   : > { %3491 = vmatprep.mubr.msk.f32.mxu1 %vm1182_vm5, %v4609_v52  ;;  %3548 = vmatprep.mubr.msk.f32.mxu0 %vm1182_vm5, %v4639_v30 }
 0x22e   : > { %3492 = vmatmul.mubr.msk.f32.gmra.mxu1 %vm1182_vm5, %v4619_v15  ;;  %3549 = vmatmul.mubr.msk.f32.gmra.mxu0 %vm1182_vm5, %v4644_v21 }
 0x22f   : > { %3494 = vmatprep.mubr.msk.f32.mxu1 %vm1182_vm5, %v4639_v30  ;;  %3551 = vmatprep.mubr.msk.f32.mxu0 %vm1182_vm5, %v4655_v48 }
 0x232   : > { %3495 = vmatmul.mubr.msk.f32.gmra.mxu1 %vm1182_vm5, %v4644_v21  ;;  %3552 = vmatmul.mubr.msk.f32.gmra.mxu0 %vm1182_vm5, %v4660_v32 }
 0x233   : > { %3497 = vmatprep.mubr.msk.f32.mxu1 %vm1182_vm5, %v4655_v48  ;;  %3554 = vmatprep.mubr.msk.f32.mxu0 %vm1182_vm5, %v4671_v49 }
 0x236   : > { %3498 = vmatmul.mubr.msk.f32.gmra.mxu1 %vm1182_vm5, %v4660_v32  ;;  %3555 = vmatmul.mubr.msk.f32.gmra.mxu0 %vm1182_vm5, %v4676_v5 }
 0x237   : > { %3500 = vmatprep.mubr.msk.f32.mxu1 %vm1182_vm5, %v4671_v49  ;;  %3557 = vmatprep.mubr.msk.f32.mxu0 %vm1182_vm5, %v4687_v19 }
 0x23a   : > { %3501 = vmatmul.mubr.msk.f32.gmra.mxu1 %vm1182_vm5, %v4676_v5  ;;  %3558 = vmatmul.mubr.msk.f32.gmra.mxu0 %vm1182_vm5, %v4692_v47 }
 0x23b   : > { %3503 = vmatprep.mubr.msk.f32.mxu1 %vm1182_vm5, %v4687_v19  ;;  %3560 = vmatprep.mubr.msk.f32.mxu0 %vm1182_vm5, %v4703_v57 }
 0x23e   : > { %3504 = vmatmul.mubr.msk.f32.gmra.mxu1 %vm1182_vm5, %v4692_v47  ;;  %3561 = vmatmul.mubr.msk.f32.gmra.mxu0 %vm1182_vm5, %v4708_v45 }
 0x23f   : > { %3506 = vmatprep.mubr.msk.f32.mxu1 %vm1182_vm5, %v4703_v57  ;;  %3563 = vmatprep.mubr.msk.f32.mxu0 %vm1182_vm5, %v4719_v63  ;;  %v4919_v57 = vld [vmem:[%s5200_s5] ss:$0 sm:$0xff] }
 0x242   : > { %3507 = vmatmul.mubr.msk.f32.gmra.mxu1 %vm1182_vm5, %v4708_v45  ;;  %3564 = vmatmul.mubr.msk.f32.gmra.mxu0 %vm1182_vm5, %v4726_v9 }
 0x243   : > { %3509 = vmatprep.mubr.msk.f32.mxu1 %vm1182_vm5, %v4719_v63  ;;  %3566 = vmatprep.mubr.msk.f32.mxu0 %vm1182_vm5, %v4734_v22 }
 0x246   : > { %3510 = vmatmul.mubr.msk.f32.gmra.mxu1 %vm1182_vm5, %v4726_v9  ;;  %3567 = vmatmul.mubr.msk.f32.gmra.mxu0 %vm1182_vm5, %v4738_v1 }
 0x247   : > { %3569 = vmatprep.mubr.msk.f32.mxu0 %vm1182_vm5, %v1971_v59 }
 0x24a   : > { %3570 = vmatmul.mubr.msk.f32.gmra.mxu0 %vm1182_vm5, %v1972_v11 }
 0x252   : > { %v3406_v46 = vpop.f32.mrf.mxu0 }
 0x254   : > { %v1460_v14 = vpop.f32.mrf.mxu0 }
 0x25a   : > { %v3409_v35 = vpop.f32.mrf.mxu0 }
 0x25c   : > { %v1470_v30 = vpop.f32.mrf.mxu0 }
 0x262   : > { %v3412_v21 = vpop.f32.mrf.mxu0 }
 0x264   : > { %v1480_v37 = vpop.f32.mrf.mxu0 }
 0x26a   : > { %v3415_v49 = vpop.f32.mrf.mxu0 }
 0x26c   : > { %v1490_v34 = vpop.f32.mrf.mxu0 }
 0x272   : > { %v3418_v7 = vpop.f32.mrf.mxu0 }
 0x274   : > { %v4900_v55 = vpop.f32.mrf.mxu0 }
 0x27a   : > { %v4902_v44 = vpop.f32.mrf.mxu0 }
 0x27c   : > { %v4908_v3 = vpop.f32.mrf.mxu0 }
 0x28b   : > { %v4870_v38 = vpop.f32.mrf.mxu1 }
 0x28d   : > { %v4872_v4 = vpop.f32.mrf.mxu1 }
 0x28f   : > { %v4874_v51 = vpop.f32.mrf.mxu1 }
 0x291   : > { %v4876_v50 = vpop.f32.mrf.mxu1 }
 0x296   : > { %v4878_v23 = vpop.f32.mrf.mxu1 }
 0x298   : > { %v4880_v27 = vpop.f32.mrf.mxu1 }
 0x29e   : > { %v4882_v53 = vpop.f32.mrf.mxu1 }
 0x2a0   : > { %v4884_v52 = vpop.f32.mrf.mxu1 }
 0x2a6   : > { %v4886_v15 = vpop.f32.mrf.mxu1 }
 0x2a8   : > { %v4888_v48 = vpop.f32.mrf.mxu1 }
 0x2ae   : > { %v4890_v32 = vpop.f32.mrf.mxu1 }
 0x2b0   : > { %v4892_v5 = vpop.f32.mrf.mxu1 }
 0x2b6   : > { %v4894_v31 = vpop.f32.mrf.mxu1 }
 0x2b8   : > { %v4896_v17 = vpop.f32.mrf.mxu1 }
 0x2be   : > { %v4898_v26 = vpop.f32.mrf.mxu1 }
 0x2c0   : > { %v4904_v10 = vpop.f32.mrf.mxu1 }
 0x2c6   : > { %v4906_v8 = vpop.f32.mrf.mxu1 }
 0x2c8   : > { %v4910_v19 = vpop.f32.mrf.mxu1 }
 0x2ca   : > { %v4912_v47 = vpop.f32.mrf.mxu0  ;;  %v3466_v58 = vpop.f32.mrf.mxu1 }
 0x2cb   : > { %v1787_v20 = vadd.f32 %v3466_v58, %v3406_v46 }
 0x2cc   : > { %v4914_v42 = vpop.f32.mrf.mxu0  ;;  %v1781_v43 = vpop.f32.mrf.mxu1 }
 0x2cd   : > { %v1782_v39 = vadd.f32 %v1781_v43, %v1460_v14 }
 0x2ce   : > { %v3469_v18 = vpop.f32.mrf.mxu1  ;;  %v3526_v36 = vpop.f32.mrf.mxu0 }
 0x2cf   : > { %v2302_v61 = vadd.f32 %v3526_v36, %v1787_v20  ;;  %v1797_v41 = vadd.f32 %v3469_v18, %v3409_v35 }
 0x2d0   : > { %v1791_v45 = vpop.f32.mrf.mxu1  ;;  %v2142_v56 = vpop.f32.mrf.mxu0 }
 0x2d1   : > { %v2301_v40 = vadd.f32 %v2142_v56, %v1782_v39  ;;  %v2341_v25 = vadd.f32 %v4919_v57, %v2302_v61  ;;  %v1792_v13 = vadd.f32 %v1791_v45, %v1470_v30 }
 0x2d2   : > { %v3472_v62 = vpop.f32.mrf.mxu1  ;;  %v3529_v54 = vpop.f32.mrf.mxu0 }
 0x2d3   : > { %v2340_v24 = vadd.f32 %v4919_v57, %v2301_v40  ;;  %v2304_v63 = vadd.f32 %v3529_v54, %v1797_v41  ;;  %v1807_v29 = vadd.f32 %v3472_v62, %v3412_v21  ;;  %v2373_v12 = vmax.f32 %v2341_v25, 0.0 }
 0x2d4   : > { %v1801_v6 = vpop.f32.mrf.mxu1  ;;  %v2152_v9 = vpop.f32.mrf.mxu0 }
 0x2d5   : > { %v2372_v0 = vmax.f32 %v2340_v24, 0.0  ;;  %v2303_v22 = vadd.f32 %v2152_v9, %v1792_v13  ;;  %v2343_v1 = vadd.f32 %v4919_v57, %v2304_v63  ;;  %v1802_v33 = vadd.f32 %v1801_v6, %v1480_v37 }
 0x2d6   : > { %v3475_v28 = vpop.f32.mrf.mxu1  ;;  %v3532_v60 = vpop.f32.mrf.mxu0 }
 0x2d7   : > { %v2342_v16 = vadd.f32 %v4919_v57, %v2303_v22  ;;  %v2306_v2 = vadd.f32 %v3532_v60, %v1807_v29  ;;  %3576 = vmatprep.mubr.msk.f32.mxu1 %vm1116_vm3, %v2372_v0  ;;  %v1817_v14 = vadd.f32 %v3475_v28, %v3415_v49  ;;  %v2375_v30 = vmax.f32 %v2343_v1, 0.0 }
 0x2d8   : > { %v1811_v59 = vpop.f32.mrf.mxu1  ;;  %v2162_v11 = vpop.f32.mrf.mxu0  ;;  %3577 = vmatmul.mubr.msk.f32.vlgmr.msra.gmra.mxu1 %vm1116_vm3, %v2373_v12 }
 0x2d9   : > { %v2374_v46 = vmax.f32 %v2342_v16, 0.0  ;;  %v2305_v35 = vadd.f32 %v2162_v11, %v1802_v33  ;;  %v2345_v21 = vadd.f32 %v4919_v57, %v2306_v2  ;;  %v1812_v20 = vadd.f32 %v1811_v59, %v1490_v34 }
 0x2da   : > { %v3478_v58 = vpop.f32.mrf.mxu1  ;;  %v3535_v43 = vpop.f32.mrf.mxu0 }
 0x2db   : > { %v2344_v37 = vadd.f32 %v4919_v57, %v2305_v35  ;;  %v2308_v18 = vadd.f32 %v3535_v43, %v1817_v14  ;;  %3579 = vmatprep.mubr.msk.f32.mxu1 %vm1116_vm3, %v2374_v46  ;;  %v1827_v45 = vadd.f32 %v3478_v58, %v3418_v7  ;;  %v2377_v49 = vmax.f32 %v2345_v21, 0.0 }
 0x2dc   : > { %v1821_v36 = vpop.f32.mrf.mxu1  ;;  %v2172_v39 = vpop.f32.mrf.mxu0  ;;  %3580 = vmatmul.mubr.msk.f32.gmra.mxu1 %vm1116_vm3, %v2375_v30 }
 0x2dd   : > { %v2376_v61 = vmax.f32 %v2344_v37, 0.0  ;;  %v2307_v56 = vadd.f32 %v2172_v39, %v1812_v20  ;;  %v2347_v41 = vadd.f32 %v4919_v57, %v2308_v18  ;;  %v1822_v62 = vadd.f32 %v1821_v36, %v4900_v55 }
 0x2de   : > { %v3481_v40 = vpop.f32.mrf.mxu1  ;;  %v3538_v25 = vpop.f32.mrf.mxu0 }
 0x2df   : > { %v2346_v34 = vadd.f32 %v4919_v57, %v2307_v56  ;;  %v2310_v54 = vadd.f32 %v3538_v25, %v1827_v45  ;;  %3582 = vmatprep.mubr.msk.f32.mxu1 %vm1116_vm3, %v2376_v61  ;;  %v1837_v7 = vadd.f32 %v3481_v40, %v4902_v44  ;;  %v2379_v9 = vmax.f32 %v2347_v41, 0.0 }
 0x2e0   : > { %v1831_v13 = vpop.f32.mrf.mxu1  ;;  %v2182_v24 = vpop.f32.mrf.mxu0  ;;  %3583 = vmatmul.mubr.msk.f32.gmra.mxu1 %vm1116_vm3, %v2377_v49 }
 0x2e1   : > { %v2378_v63 = vmax.f32 %v2346_v34, 0.0  ;;  %v2309_v6 = vadd.f32 %v2182_v24, %v1822_v62  ;;  %v2349_v0 = vadd.f32 %v4919_v57, %v2310_v54  ;;  %v1832_v55 = vadd.f32 %v1831_v13, %v4908_v3 }
 0x2e2   : > { %v3484_v29 = vpop.f32.mrf.mxu1  ;;  %v3541_v22 = vpop.f32.mrf.mxu0 }
 0x2e3   : > { %v2348_v12 = vadd.f32 %v4919_v57, %v2309_v6  ;;  %v2312_v1 = vadd.f32 %v3541_v22, %v1837_v7  ;;  %3585 = vmatprep.mubr.msk.f32.mxu1 %vm1116_vm3, %v2378_v63  ;;  %v1847_v44 = vadd.f32 %v3484_v29, %v4912_v47  ;;  %v2381_v2 = vmax.f32 %v2349_v0, 0.0 }
 0x2e4   : > { %v1841_v28 = vpop.f32.mrf.mxu1  ;;  %v2192_v60 = vpop.f32.mrf.mxu0  ;;  %3586 = vmatmul.mubr.msk.f32.gmra.mxu1 %vm1116_vm3, %v2379_v9 }
 0x2e5   : > { %v2380_v33 = vmax.f32 %v2348_v12, 0.0  ;;  %v2311_v16 = vadd.f32 %v2192_v60, %v1832_v55  ;;  %v2351_v59 = vadd.f32 %v4919_v57, %v2312_v1  ;;  %v1842_v3 = vadd.f32 %v1841_v28, %v4914_v42 }
 0x2e6   : > { %v3487_v11 = vpop.f32.mrf.mxu1  ;;  %v3544_v46 = vpop.f32.mrf.mxu0 }
 0x2e7   : > { %v2350_v14 = vadd.f32 %v4919_v57, %v2311_v16  ;;  %v2314_v35 = vadd.f32 %v3544_v46, %v1847_v44  ;;  %3588 = vmatprep.mubr.msk.f32.mxu1 %vm1116_vm3, %v2380_v33  ;;  %v1857_v47 = vadd.f32 %v3487_v11, %v4870_v38  ;;  %v2383_v20 = vmax.f32 %v2351_v59, 0.0 }
 0x2e8   : > { %v1851_v30 = vpop.f32.mrf.mxu1  ;;  %v2202_v21 = vpop.f32.mrf.mxu0  ;;  %3589 = vmatmul.mubr.msk.f32.gmra.mxu1 %vm1116_vm3, %v2381_v2 }
 0x2e9   : > { %v2382_v58 = vmax.f32 %v2350_v14, 0.0  ;;  %v2313_v43 = vadd.f32 %v2202_v21, %v1842_v3  ;;  %v2353_v37 = vadd.f32 %v4919_v57, %v2314_v35  ;;  %v1852_v42 = vadd.f32 %v1851_v30, %v4872_v4 }
 0x2ea   : > { %v3490_v18 = vpop.f32.mrf.mxu1  ;;  %v3547_v36 = vpop.f32.mrf.mxu0 }
 0x2eb   : > { %v2352_v39 = vadd.f32 %v4919_v57, %v2313_v43  ;;  %v2316_v61 = vadd.f32 %v3547_v36, %v1857_v47  ;;  %3591 = vmatprep.mubr.msk.f32.mxu1 %vm1116_vm3, %v2382_v58  ;;  %v1867_v38 = vadd.f32 %v3490_v18, %v4874_v51  ;;  %v2385_v40 = vmax.f32 %v2353_v37, 0.0 }
 0x2ec   : > { %v1861_v45 = vpop.f32.mrf.mxu1  ;;  %v2212_v56 = vpop.f32.mrf.mxu0  ;;  %3592 = vmatmul.mubr.msk.f32.gmra.mxu1 %vm1116_vm3, %v2383_v20 }
 0x2ed   : > { %v2384_v49 = vmax.f32 %v2352_v39, 0.0  ;;  %v2315_v41 = vadd.f32 %v2212_v56, %v1852_v42  ;;  %v2355_v25 = vadd.f32 %v4919_v57, %v2316_v61  ;;  %v1862_v4 = vadd.f32 %v1861_v45, %v4876_v50 }
 0x2ee   : > { %v3493_v62 = vpop.f32.mrf.mxu1  ;;  %v3550_v34 = vpop.f32.mrf.mxu0 }
 0x2ef   : > { %v2354_v54 = vadd.f32 %v4919_v57, %v2315_v41  ;;  %v2318_v13 = vadd.f32 %v3550_v34, %v1867_v38  ;;  %3594 = vmatprep.mubr.msk.f32.mxu1 %vm1116_vm3, %v2384_v49  ;;  %v1877_v51 = vadd.f32 %v3493_v62, %v4878_v23  ;;  %v2387_v9 = vmax.f32 %v2355_v25, 0.0 }
 0x2f0   : > { %v1871_v24 = vpop.f32.mrf.mxu1  ;;  %v2222_v63 = vpop.f32.mrf.mxu0  ;;  %3595 = vmatmul.mubr.msk.f32.gmra.mxu1 %vm1116_vm3, %v2385_v40 }
 0x2f1   : > { %v2386_v7 = vmax.f32 %v2354_v54, 0.0  ;;  %v2317_v6 = vadd.f32 %v2222_v63, %v1862_v4  ;;  %v2357_v0 = vadd.f32 %v4919_v57, %v2318_v13  ;;  %v1872_v50 = vadd.f32 %v1871_v24, %v4880_v27 }
 0x2f2   : > { %v3496_v29 = vpop.f32.mrf.mxu1  ;;  %v3553_v22 = vpop.f32.mrf.mxu0 }
 0x2f3   : > { %v2356_v55 = vadd.f32 %v4919_v57, %v2317_v6  ;;  %v2320_v12 = vadd.f32 %v3553_v22, %v1877_v51  ;;  %3597 = vmatprep.mubr.msk.f32.mxu1 %vm1116_vm3, %v2386_v7  ;;  %v1887_v23 = vadd.f32 %v3496_v29, %v4882_v53  ;;  %v2389_v44 = vmax.f32 %v2357_v0, 0.0 }
 0x2f4   : > { %v1881_v1 = vpop.f32.mrf.mxu1  ;;  %v2232_v28 = vpop.f32.mrf.mxu0  ;;  %3598 = vmatmul.mubr.msk.f32.gmra.mxu1 %vm1116_vm3, %v2387_v9 }
 0x2f5   : > { %v2388_v60 = vmax.f32 %v2356_v55, 0.0  ;;  %v2319_v33 = vadd.f32 %v2232_v28, %v1872_v50  ;;  %v2359_v16 = vadd.f32 %v4919_v57, %v2320_v12  ;;  %v1882_v27 = vadd.f32 %v1881_v1, %v4884_v52 }
 0x2f6   : > { %v3499_v2 = vpop.f32.mrf.mxu1  ;;  %v3556_v59 = vpop.f32.mrf.mxu0 }
 0x2f7   : > { %v2358_v11 = vadd.f32 %v4919_v57, %v2319_v33  ;;  %v2322_v46 = vadd.f32 %v3556_v59, %v1887_v23  ;;  %3600 = vmatprep.mubr.msk.f32.mxu1 %vm1116_vm3, %v2388_v60  ;;  %v1897_v53 = vadd.f32 %v3499_v2, %v4886_v15  ;;  %v2391_v21 = vmax.f32 %v2359_v16, 0.0 }
 0x2f8   : > { %v1891_v3 = vpop.f32.mrf.mxu1  ;;  %v2242_v14 = vpop.f32.mrf.mxu0  ;;  %3601 = vmatmul.mubr.msk.f32.gmra.mxu1 %vm1116_vm3, %v2389_v44 }
 0x2f9   : > { %v2390_v35 = vmax.f32 %v2358_v11, 0.0  ;;  %v2321_v30 = vadd.f32 %v2242_v14, %v1882_v27  ;;  %v2361_v58 = vadd.f32 %v4919_v57, %v2322_v46  ;;  %v1892_v52 = vadd.f32 %v1891_v3, %v4888_v48 }
 0x2fa   : > { %v3502_v47 = vpop.f32.mrf.mxu1  ;;  %v3559_v43 = vpop.f32.mrf.mxu0 }
 0x2fb   : > { %v2360_v20 = vadd.f32 %v4919_v57, %v2321_v30  ;;  %v2324_v37 = vadd.f32 %v3559_v43, %v1897_v53  ;;  %3603 = vmatprep.mubr.msk.f32.mxu1 %vm1116_vm3, %v2390_v35  ;;  %v1907_v15 = vadd.f32 %v3502_v47, %v4890_v32  ;;  %v2393_v61 = vmax.f32 %v2361_v58, 0.0  ;;  %v5011_v30 = vld [vmem:[%s5201_s6] ss:$0 sm:$0xff] }
 0x2fc   : > { %v1901_v18 = vpop.f32.mrf.mxu1  ;;  %v2252_v36 = vpop.f32.mrf.mxu0  ;;  %3604 = vmatmul.mubr.msk.f32.gmra.mxu1 %vm1116_vm3, %v2391_v21  ;;  %v2734_v43 = vld [vmem:[%s3935_s15] sm:$0xff] }
 0x2fd   : > { %v2392_v42 = vmax.f32 %v2360_v20, 0.0  ;;  %v2323_v39 = vadd.f32 %v2252_v36, %v1892_v52  ;;  %v2363_v45 = vadd.f32 %v4919_v57, %v2324_v37  ;;  %v1902_v48 = vadd.f32 %v1901_v18, %v4892_v5  ;;  %v2737_v18 = vld [vmem:[%s3935_s15 + $0x18] sm:$0xff] }
 0x2fe   : > { %v3505_v56 = vpop.f32.mrf.mxu1  ;;  %v3562_v49 = vpop.f32.mrf.mxu0 }
 0x2ff   : > { %v2362_v38 = vadd.f32 %v4919_v57, %v2323_v39  ;;  %v2326_v41 = vadd.f32 %v3562_v49, %v1907_v15  ;;  %3606 = vmatprep.mubr.msk.f32.mxu1 %vm1116_vm3, %v2392_v42  ;;  %v1917_v32 = vadd.f32 %v3505_v56, %v4894_v31  ;;  %v2395_v4 = vmax.f32 %v2363_v45, 0.0 }
 0x300   : > { %v1911_v40 = vpop.f32.mrf.mxu1  ;;  %v2262_v25 = vpop.f32.mrf.mxu0  ;;  %3607 = vmatmul.mubr.msk.f32.gmra.mxu1 %vm1116_vm3, %v2393_v61  ;;  %v2736_v61 = vld [vmem:[%s3935_s15 + $0x10] sm:$0xff] }
 0x301   : > { %v2394_v62 = vmax.f32 %v2362_v38, 0.0  ;;  %v2325_v34 = vadd.f32 %v2262_v25, %v1902_v48  ;;  %v2365_v54 = vadd.f32 %v4919_v57, %v2326_v41  ;;  %v1912_v5 = vadd.f32 %v1911_v40, %v4896_v17  ;;  %v2739_v38 = vld [vmem:[%s3935_s15 + $0x28] sm:$0xff] }
 0x302   : > { %v3508_v13 = vpop.f32.mrf.mxu1  ;;  %v3565_v24 = vpop.f32.mrf.mxu0 }
 0x303   : > { %v2364_v63 = vadd.f32 %v4919_v57, %v2325_v34  ;;  %v2328_v7 = vadd.f32 %v3565_v24, %v1917_v32  ;;  %3609 = vmatprep.mubr.msk.f32.mxu1 %vm1116_vm3, %v2394_v62  ;;  %v1927_v31 = vadd.f32 %v3508_v13, %v4898_v26  ;;  %v2397_v29 = vmax.f32 %v2365_v54, 0.0  ;;  %v2738_v32 = vld [vmem:[%s3935_s15 + $0x20] sm:$0xff]  ;;  %v2741_v24 = vld [vmem:[%s3935_s15 + $0x38] sm:$0xff] }
 0x304   : > { %v1921_v51 = vpop.f32.mrf.mxu1  ;;  %v2272_v6 = vpop.f32.mrf.mxu0  ;;  %3610 = vmatmul.mubr.msk.f32.gmra.mxu1 %vm1116_vm3, %v2395_v4 }
 0x305   : > { %v2396_v9 = vmax.f32 %v2364_v63, 0.0  ;;  %v2327_v0 = vadd.f32 %v2272_v6, %v1912_v5  ;;  %v2367_v22 = vadd.f32 %v4919_v57, %v2328_v7  ;;  %v1922_v17 = vadd.f32 %v1921_v51, %v4904_v10  ;;  %v2740_v6 = vld [vmem:[%s3935_s15 + $0x30] sm:$0xff] }
 0x306   : > { %v3511_v50 = vpop.f32.mrf.mxu1  ;;  %v3568_v55 = vpop.f32.mrf.mxu0 }
 0x307   : > { %v2366_v12 = vadd.f32 %v4919_v57, %v2327_v0  ;;  %v2330_v1 = vadd.f32 %v3568_v55, %v1927_v31  ;;  %3612 = vmatprep.mubr.msk.f32.mxu1 %vm1116_vm3, %v2396_v9  ;;  %v1937_v26 = vadd.f32 %v3511_v50, %v4906_v8  ;;  %v2399_v44 = vmax.f32 %v2367_v22, 0.0  ;;  %v2743_v22 = vld [vmem:[%s3935_s15 + $0x48] sm:$0xff] }
 0x308   : > { %v1931_v28 = vpop.f32.mrf.mxu1  ;;  %v2282_v60 = vpop.f32.mrf.mxu0  ;;  %3613 = vmatmul.mubr.msk.f32.gmra.mxu1 %vm1116_vm3, %v2397_v29 }
 0x309   : > { %v2398_v23 = vmax.f32 %v2366_v12, 0.0  ;;  %v2329_v33 = vadd.f32 %v2282_v60, %v1922_v17  ;;  %v2369_v16 = vadd.f32 %v4919_v57, %v2330_v1  ;;  %v1932_v59 = vadd.f32 %v1931_v28, %v4910_v19  ;;  %v2742_v1 = vld [vmem:[%s3935_s15 + $0x40] sm:$0xff] }
 0x30a   : > { %v3571_v2 = vpop.f32.mrf.mxu0 }
 0x30b   : > { %v2368_v10 = vadd.f32 %v4919_v57, %v2329_v33  ;;  %v2332_v27 = vadd.f32 %v3571_v2, %v1937_v26  ;;  %3615 = vmatprep.mubr.msk.f32.mxu1 %vm1116_vm3, %v2398_v23  ;;  %v2401_v8 = vmax.f32 %v2369_v16, 0.0  ;;  %v2745_v33 = vld [vmem:[%s3935_s15 + $0x58] sm:$0xff] }
 0x30c   : > { %v2292_v11 = vpop.f32.mrf.mxu0  ;;  %3616 = vmatmul.mubr.msk.f32.gmra.mxu1 %vm1116_vm3, %v2399_v44 }
 0x30d   : > { %v2400_v46 = vmax.f32 %v2368_v10, 0.0  ;;  %v2331_v3 = vadd.f32 %v2292_v11, %v1932_v59  ;;  %v2371_v14 = vadd.f32 %v4919_v57, %v2332_v27  ;;  %v2744_v10 = vld [vmem:[%s3935_s15 + $0x50] sm:$0xff] }
 0x30f   : > { %v2370_v35 = vadd.f32 %v4919_v57, %v2331_v3  ;;  %3618 = vmatprep.mubr.msk.f32.mxu1 %vm1116_vm3, %v2400_v46  ;;  %v2403_v53 = vmax.f32 %v2371_v14, 0.0  ;;  %v2735_v57 = vld [vmem:[%s3935_s15 + $0x8] sm:$0xff] }
 0x310   : > { %3619 = vmatmul.mubr.msk.f32.gmra.mxu1 %vm1116_vm3, %v2401_v8  ;;  %v2747_v8 = vld [vmem:[%s3935_s15 + $0x68] sm:$0xff] }
 0x311   : > { %v2402_v19 = vmax.f32 %v2370_v35, 0.0 }
 0x313   : > { %3621 = vmatprep.mubr.msk.f32.mxu1 %vm1116_vm3, %v2402_v19 }
 0x314   : > { %3622 = vmatmul.mubr.msk.f32.gmra.mxu1 %vm1116_vm3, %v2403_v53 }
 0x398   : > { %v3578_v21 = vpop.f32.mrf.mxu1 }
 0x399   : > { %v2581_v58 = vadd.f32 %v3578_v21, %v5011_v30  ;;  %v2746_v21 = vld [vmem:[%s3935_s15 + $0x60] sm:$0xff] }
 0x39a   : > { %v2575_v47 = vpop.f32.mrf.mxu1 }
 0x39b   : > { %v2767_v52 = vadd.f32 %v2735_v57, %v2581_v58  ;;  %v2576_v20 = vadd.f32 %v5011_v30, %v2575_v47 }
 0x39c   : > { %v3581_v37 = vpop.f32.mrf.mxu1 }
 0x39d   : > { %v2799_v36 = vmax.f32 %v2767_v52, 0.0  ;;  %v2766_v42 = vadd.f32 %v2734_v43, %v2576_v20  ;;  %v2591_v15 = vadd.f32 %v3581_v37, %v5011_v30  ;;  %v2749_v52 = vld [vmem:[%s3935_s15 + $0x78] sm:$0xff] }
 0x39e   : > { %v2585_v39 = vpop.f32.mrf.mxu1 }
 0x39f   : > { %2831 = vst.msk [vmem:[%s5022_s16 + $0x8] sm:$0xff] %vm344_vm0, %v2799_v36  ;;  %v2798_v45 = vmax.f32 %v2766_v42, 0.0  ;;  %v2769_v56 = vadd.f32 %v2737_v18, %v2591_v15  ;;  %v2586_v49 = vadd.f32 %v5011_v30, %v2585_v39  ;;  %v2748_v42 = vld [vmem:[%s3935_s15 + $0x70] sm:$0xff] }
 0x3a0   : > { %v3584_v48 = vpop.f32.mrf.mxu1 }
 0x3a1   : > { %2830 = vst.msk [vmem:[%s5022_s16] sm:$0xff] %vm344_vm0, %v2798_v45  ;;  %v2801_v41 = vmax.f32 %v2769_v56, 0.0  ;;  %v2768_v40 = vadd.f32 %v2736_v61, %v2586_v49  ;;  %v2601_v25 = vadd.f32 %v3584_v48, %v5011_v30  ;;  %v2751_v56 = vld [vmem:[%s3935_s15 + $0x88] sm:$0xff] }
 0x3a2   : > { %v2595_v62 = vpop.f32.mrf.mxu1 }
 0x3a3   : > { %2833 = vst.msk [vmem:[%s5022_s16 + $0x18] sm:$0xff] %vm344_vm0, %v2801_v41  ;;  %v2800_v34 = vmax.f32 %v2768_v40, 0.0  ;;  %v2771_v4 = vadd.f32 %v2739_v38, %v2601_v25  ;;  %v2596_v54 = vadd.f32 %v5011_v30, %v2595_v62  ;;  %v2750_v40 = vld [vmem:[%s3935_s15 + $0x80] sm:$0xff] }
 0x3a4   : > { %v3587_v13 = vpop.f32.mrf.mxu1 }
 0x3a5   : > { %2832 = vst.msk [vmem:[%s5022_s16 + $0x10] sm:$0xff] %vm344_vm0, %v2800_v34  ;;  %v2803_v5 = vmax.f32 %v2771_v4, 0.0  ;;  %v2770_v63 = vadd.f32 %v2738_v32, %v2596_v54  ;;  %v2611_v7 = vadd.f32 %v3587_v13, %v5011_v30  ;;  %v2753_v4 = vld [vmem:[%s3935_s15 + $0x98] sm:$0xff] }
 0x3a6   : > { %v2605_v51 = vpop.f32.mrf.mxu1 }
 0x3a7   : > { %2835 = vst.msk [vmem:[%s5022_s16 + $0x28] sm:$0xff] %vm344_vm0, %v2803_v5  ;;  %v2802_v9 = vmax.f32 %v2770_v63, 0.0  ;;  %v2773_v31 = vadd.f32 %v2741_v24, %v2611_v7  ;;  %v2606_v0 = vadd.f32 %v5011_v30, %v2605_v51  ;;  %v2752_v63 = vld [vmem:[%s3935_s15 + $0x90] sm:$0xff] }
 0x3a8   : > { %v3590_v29 = vpop.f32.mrf.mxu1 }
 0x3a9   : > { %2834 = vst.msk [vmem:[%s5022_s16 + $0x20] sm:$0xff] %vm344_vm0, %v2802_v9  ;;  %v2805_v50 = vmax.f32 %v2773_v31, 0.0  ;;  %v2772_v55 = vadd.f32 %v2740_v6, %v2606_v0  ;;  %v2621_v17 = vadd.f32 %v3590_v29, %v5011_v30  ;;  %v2755_v31 = vld [vmem:[%s3935_s15 + $0xa8] sm:$0xff] }
 0x3aa   : > { %v2615_v12 = vpop.f32.mrf.mxu1 }
 0x3ab   : > { %2837 = vst.msk [vmem:[%s5022_s16 + $0x38] sm:$0xff] %vm344_vm0, %v2805_v50  ;;  %v2804_v28 = vmax.f32 %v2772_v55, 0.0  ;;  %v2775_v60 = vadd.f32 %v2743_v22, %v2621_v17  ;;  %v2616_v23 = vadd.f32 %v5011_v30, %v2615_v12  ;;  %v2754_v55 = vld [vmem:[%s3935_s15 + $0xa0] sm:$0xff] }
 0x3ac   : > { %v3593_v26 = vpop.f32.mrf.mxu1 }
 0x3ad   : > { %2836 = vst.msk [vmem:[%s5022_s16 + $0x30] sm:$0xff] %vm344_vm0, %v2804_v28  ;;  %v2807_v44 = vmax.f32 %v2775_v60, 0.0  ;;  %v2774_v16 = vadd.f32 %v2742_v1, %v2616_v23  ;;  %v2631_v2 = vadd.f32 %v3593_v26, %v5011_v30  ;;  %v2757_v60 = vld [vmem:[%s3935_s15 + $0xb8] sm:$0xff] }
 0x3ae   : > { %v2625_v59 = vpop.f32.mrf.mxu1 }
 0x3af   : > { %2839 = vst.msk [vmem:[%s5022_s16 + $0x48] sm:$0xff] %vm344_vm0, %v2807_v44  ;;  %v2806_v27 = vmax.f32 %v2774_v16, 0.0  ;;  %v2777_v11 = vadd.f32 %v2745_v33, %v2631_v2  ;;  %v2626_v46 = vadd.f32 %v5011_v30, %v2625_v59  ;;  %v2756_v16 = vld [vmem:[%s3935_s15 + $0xb0] sm:$0xff] }
 0x3b0   : > { %v3596_v3 = vpop.f32.mrf.mxu1 }
 0x3b1   : > { %2838 = vst.msk [vmem:[%s5022_s16 + $0x40] sm:$0xff] %vm344_vm0, %v2806_v27  ;;  %v2809_v14 = vmax.f32 %v2777_v11, 0.0  ;;  %v2776_v35 = vadd.f32 %v2744_v10, %v2626_v46  ;;  %v2641_v19 = vadd.f32 %v3596_v3, %v5011_v30  ;;  %v2759_v11 = vld [vmem:[%s3935_s15 + $0xc8] sm:$0xff] }
 0x3b2   : > { %v2635_v53 = vpop.f32.mrf.mxu1 }
 0x3b3   : > { %2841 = vst.msk [vmem:[%s5022_s16 + $0x58] sm:$0xff] %vm344_vm0, %v2809_v14  ;;  %v2808_v57 = vmax.f32 %v2776_v35, 0.0  ;;  %v2779_v58 = vadd.f32 %v2747_v8, %v2641_v19  ;;  %v2636_v47 = vadd.f32 %v5011_v30, %v2635_v53  ;;  %v2758_v35 = vld [vmem:[%s3935_s15 + $0xc0] sm:$0xff] }
 0x3b4   : > { %v3599_v43 = vpop.f32.mrf.mxu1 }
 0x3b5   : > { %2840 = vst.msk [vmem:[%s5022_s16 + $0x50] sm:$0xff] %vm344_vm0, %v2808_v57  ;;  %v2811_v20 = vmax.f32 %v2779_v58, 0.0  ;;  %v2778_v37 = vadd.f32 %v2746_v21, %v2636_v47  ;;  %v2651_v18 = vadd.f32 %v3599_v43, %v5011_v30  ;;  %v2761_v58 = vld [vmem:[%s3935_s15 + $0xd8] sm:$0xff] }
 0x3b6   : > { %v2645_v36 = vpop.f32.mrf.mxu1 }
 0x3b7   : > { %2843 = vst.msk [vmem:[%s5022_s16 + $0x68] sm:$0xff] %vm344_vm0, %v2811_v20  ;;  %v2810_v15 = vmax.f32 %v2778_v37, 0.0  ;;  %v2781_v39 = vadd.f32 %v2749_v52, %v2651_v18  ;;  %v2646_v61 = vadd.f32 %v5011_v30, %v2645_v36  ;;  %v2760_v37 = vld [vmem:[%s3935_s15 + $0xd0] sm:$0xff] }
 0x3b8   : > { %v3602_v45 = vpop.f32.mrf.mxu1 }
 0x3b9   : > { %2842 = vst.msk [vmem:[%s5022_s16 + $0x60] sm:$0xff] %vm344_vm0, %v2810_v15  ;;  %v2813_v49 = vmax.f32 %v2781_v39, 0.0  ;;  %v2780_v48 = vadd.f32 %v2748_v42, %v2646_v61  ;;  %v2661_v38 = vadd.f32 %v3602_v45, %v5011_v30  ;;  %v2763_v39 = vld [vmem:[%s3935_s15 + $0xe8] sm:$0xff] }
 0x3ba   : > { %v2655_v41 = vpop.f32.mrf.mxu1 }
 0x3bb   : > { %2845 = vst.msk [vmem:[%s5022_s16 + $0x78] sm:$0xff] %vm344_vm0, %v2813_v49  ;;  %v2812_v25 = vmax.f32 %v2780_v48, 0.0  ;;  %v2783_v62 = vadd.f32 %v2751_v56, %v2661_v38  ;;  %v2656_v32 = vadd.f32 %v5011_v30, %v2655_v41  ;;  %v2762_v48 = vld [vmem:[%s3935_s15 + $0xe0] sm:$0xff] }
 0x3bc   : > { %v3605_v34 = vpop.f32.mrf.mxu1 }
 0x3bd   : > { %2844 = vst.msk [vmem:[%s5022_s16 + $0x70] sm:$0xff] %vm344_vm0, %v2812_v25  ;;  %v2815_v54 = vmax.f32 %v2783_v62, 0.0  ;;  %v2782_v13 = vadd.f32 %v2750_v40, %v2656_v32  ;;  %v2671_v24 = vadd.f32 %v3605_v34, %v5011_v30  ;;  %v2765_v62 = vld [vmem:[%s3935_s15 + $0xf8] sm:$0xff] }
 0x3be   : > { %v2665_v5 = vpop.f32.mrf.mxu1 }
 0x3bf   : > { %2847 = vst.msk [vmem:[%s5022_s16 + $0x88] sm:$0xff] %vm344_vm0, %v2815_v54  ;;  %v2814_v7 = vmax.f32 %v2782_v13, 0.0  ;;  %v2785_v51 = vadd.f32 %v2753_v4, %v2671_v24  ;;  %v2666_v6 = vadd.f32 %v5011_v30, %v2665_v5  ;;  %v2764_v13 = vld [vmem:[%s3935_s15 + $0xf0] sm:$0xff]  ;;  %s3717_s15 = scalar_lea.vmem %s5148_s18, 4096 }
 0x3c0   : > { %v3608_v9 = vpop.f32.mrf.mxu1  ;;  %p3718_p11 = scmp.ne.s32.totalorder %s5148_s18, %s3717_s15  ;;  %p3725_p7 = scmp.lt.s32.totalorder %s3723_s21, %s3717_s15 }
 0x3c1   : > { %2846 = vst.msk [vmem:[%s5022_s16 + $0x80] sm:$0xff] %vm344_vm0, %v2814_v7  ;;  %v2817_v0 = vmax.f32 %v2785_v51, 0.0  ;;  %v2784_v29 = vadd.f32 %v2752_v63, %v2666_v6  ;;  %v2681_v22 = vadd.f32 %v3608_v9, %v5011_v30 }
 0x3c2   : > { %v2675_v50 = vpop.f32.mrf.mxu1  ;;  %p3719_p13 = pnand %p3718_p11, %p5247_p12  ;;  %p3726_p8 = por %p3725_p7, %p3724_p5 }
 0x3c3   : > { %2849 = vst.msk [vmem:[%s5022_s16 + $0x98] sm:$0xff] %vm344_vm0, %v2817_v0  ;;  %v2816_v17 = vmax.f32 %v2784_v29, 0.0  ;;  %v2787_v12 = vadd.f32 %v2755_v31, %v2681_v22  ;;  %v2676_v1 = vadd.f32 %v5011_v30, %v2675_v50 }
 0x3c4   : > { %v3611_v28 = vpop.f32.mrf.mxu1  ;;  %p3720_p4 = pneg %p3719_p13 }
 0x3c5   : > { %2848 = vst.msk [vmem:[%s5022_s16 + $0x90] sm:$0xff] %vm344_vm0, %v2816_v17  ;;  %v2819_v23 = vmax.f32 %v2787_v12, 0.0  ;;  %v2786_v26 = vadd.f32 %v2754_v55, %v2676_v1  ;;  %v2691_v33 = vadd.f32 %v3611_v28, %v5011_v30 }
 0x3c6   : > { %v2685_v44 = vpop.f32.mrf.mxu1  ;;  %p3727_p10 = pnand %p3726_p8, %p3720_p4 }
 0x3c7   : > { %2851 = vst.msk [vmem:[%s5022_s16 + $0xa8] sm:$0xff] %vm344_vm0, %v2819_v23  ;;  %v2818_v2 = vmax.f32 %v2786_v26, 0.0  ;;  %v2789_v59 = vadd.f32 %v2757_v60, %v2691_v33  ;;  %v2686_v10 = vadd.f32 %v5011_v30, %v2685_v44 }
 0x3c8   : > { %v3614_v27 = vpop.f32.mrf.mxu1 }
 0x3c9   : > { %2850 = vst.msk [vmem:[%s5022_s16 + $0xa0] sm:$0xff] %vm344_vm0, %v2818_v2  ;;  %v2821_v46 = vmax.f32 %v2789_v59, 0.0  ;;  %v2788_v3 = vadd.f32 %v2756_v16, %v2686_v10  ;;  %v2701_v8 = vadd.f32 %v3614_v27, %v5011_v30 }
 0x3ca   : > { %v2695_v14 = vpop.f32.mrf.mxu1 }
 0x3cb   : > { %2853 = vst.msk [vmem:[%s5022_s16 + $0xb8] sm:$0xff] %vm344_vm0, %v2821_v46  ;;  %v2820_v19 = vmax.f32 %v2788_v3, 0.0  ;;  %v2791_v53 = vadd.f32 %v2759_v11, %v2701_v8  ;;  %v2696_v21 = vadd.f32 %v5011_v30, %v2695_v14 }
 0x3cc   : > { %v3617_v57 = vpop.f32.mrf.mxu1 }
 0x3cd   : > { %2852 = vst.msk [vmem:[%s5022_s16 + $0xb0] sm:$0xff] %vm344_vm0, %v2820_v19  ;;  %v2823_v47 = vmax.f32 %v2791_v53, 0.0  ;;  %v2790_v43 = vadd.f32 %v2758_v35, %v2696_v21  ;;  %v2711_v52 = vadd.f32 %v3617_v57, %v5011_v30 }
 0x3ce   : > { %v2705_v20 = vpop.f32.mrf.mxu1 }
 0x3cf   : > { %2855 = vst.msk [vmem:[%s5022_s16 + $0xc8] sm:$0xff] %vm344_vm0, %v2823_v47  ;;  %v2822_v18 = vmax.f32 %v2790_v43, 0.0  ;;  %v2793_v36 = vadd.f32 %v2761_v58, %v2711_v52  ;;  %v2706_v42 = vadd.f32 %v5011_v30, %v2705_v20 }
 0x3d0   : > { %v3620_v15 = vpop.f32.mrf.mxu1 }
 0x3d1   : > { %2854 = vst.msk [vmem:[%s5022_s16 + $0xc0] sm:$0xff] %vm344_vm0, %v2822_v18  ;;  %v2825_v61 = vmax.f32 %v2793_v36, 0.0  ;;  %v2792_v45 = vadd.f32 %v2760_v37, %v2706_v42  ;;  %v2721_v56 = vadd.f32 %v3620_v15, %v5011_v30 }
 0x3d2   : > { %v2715_v49 = vpop.f32.mrf.mxu1 }
 0x3d3   : > { %2857 = vst.msk [vmem:[%s5022_s16 + $0xd8] sm:$0xff] %vm344_vm0, %v2825_v61  ;;  %v2824_v38 = vmax.f32 %v2792_v45, 0.0  ;;  %v2795_v41 = vadd.f32 %v2763_v39, %v2721_v56  ;;  %v2716_v40 = vadd.f32 %v5011_v30, %v2715_v49 }
 0x3d4   : > { %v3623_v25 = vpop.f32.mrf.mxu1 }
 0x3d5   : > { %2856 = vst.msk [vmem:[%s5022_s16 + $0xd0] sm:$0xff] %vm344_vm0, %v2824_v38  ;;  %v2827_v32 = vmax.f32 %v2795_v41, 0.0  ;;  %v2794_v34 = vadd.f32 %v2762_v48, %v2716_v40  ;;  %v2731_v4 = vadd.f32 %v3623_v25, %v5011_v30 }
 0x3d6   : > { %v2725_v54 = vpop.f32.mrf.mxu1 }
 0x3d7   : > { %2859 = vst.msk [vmem:[%s5022_s16 + $0xe8] sm:$0xff] %vm344_vm0, %v2827_v32  ;;  %v2826_v24 = vmax.f32 %v2794_v34, 0.0  ;;  %v2797_v5 = vadd.f32 %v2765_v62, %v2731_v4  ;;  %v2726_v63 = vadd.f32 %v5011_v30, %v2725_v54 }
 0x3d9   : > { %2858 = vst.msk [vmem:[%s5022_s16 + $0xe0] sm:$0xff] %vm344_vm0, %v2826_v24  ;;  %v2829_v7 = vmax.f32 %v2797_v5, 0.0  ;;  %v2796_v51 = vadd.f32 %v2764_v13, %v2726_v63 }
 0x3db   : > { %2861 = vst.msk [vmem:[%s5022_s16 + $0xf8] sm:$0xff] %vm344_vm0, %v2829_v7  ;;  %v2828_v6 = vmax.f32 %v2796_v51, 0.0 }
 0x3dd   : > { %2860 = vst.msk [vmem:[%s5022_s16 + $0xf0] sm:$0xff] %vm344_vm0, %v2828_v6 }
 0x3de   : > { %3730 = shalt.err (!%p3727_p10)
}
 0x3df   : > { %s3731_s12 = scalar_lea.hbm %s5146_s23, 4096  ;;  %s3735_s16 = scalar_lea.hbm %s5202_s7, 8192 }
 0x3e0   : > { %p3732_p0 = scmp.ne.s32.totalorder %s5146_s23, %s3731_s12  ;;  %p3736_p1 = scmp.lt.s32.totalorder %s5146_s23, %s5202_s7 }
 0x3e1   : > { %p3737_p3 = scmp.lt.s32.totalorder %s3735_s16, %s3731_s12 }
 0x3e2   : > { %p3733_p2 = pnand %p3732_p0, %p5247_p12 }
 0x3e3   : > { %p3738_p6 = por %p3737_p3, %p3736_p1 }
 0x3e4   : > { %p3734_p9 = pneg %p3733_p2 }
 0x3e6   : > { %p3739_p11 = pnand %p3738_p6, %p3734_p9 }
 0x3e8   : > { %3742 = shalt.err (!%p3739_p11)
}
 0x3e9   : > { %s3790_s22 = smov 128   ;;  %s3791_s15 = smov 8  }
 0x3ea   : > { %3638 = dma.vmem_to_hbm [thread:$0]  (%p5247_p12), %s5148_s18, 4096, %s5146_s23, %s2863_s28, %s3790_s22, %s3790_s22, %s3791_s15  }
 0x3eb PF: > { %s2891_s29 = sand.u32 1, %s3769_s24   ;;  %p5248_p13 = scmp.ne.s32.totalorder %s5216_s14, 0 }
 0x3ec   : > { %p5249_p4 = scmp.ge.s32.totalorder %s3781_s27, 2  ;;  %s2892_s19 = scalar_lea.sflag [#allocation5], %s2891_s29 }
 0x3ee   : > { %p3645_p5 = pnand %p5249_p4, %p5248_p13 }
 0x3f0   : > { %p3646_p7 = pneg %p3645_p5 }
 0x3f2   : > { %3764 = dma.done.wait (%p3646_p7), %s2892_s19, 4096  }
 0x3f3   : > { %3766 = vsyncadd (%p3646_p7), %s2892_s19, 4294963200  ;;  %p20_p8 = scmp.ge.s32.totalorder %s3857_s30, 4   ;;  %s5250_s24 = smov %s3773_s25 }
 0x3f4   : > { %s5251_s25 = smov %s3777_s26  ;;  %s5252_s26 = smov %s3869_s10 }
 0x3f5   : > { %s5253_s27 = smov %s3857_s30  ;;  %22 = sbr.rel (!%p20_p8) target bundleno = 5 (0x5), region = 98 }
 0x3fa   :  { %2897 = vsyncpa [#allocation4], 1 }
 0x3fb   :  { %2899 = vsyncpa [#allocation4 + $0x1], 1 }
 0x3fc   :  { %2900 = vsyncpa [#allocation5], 1 }
 0x3fd   :  { %2902 = vsyncpa [#allocation5 + $0x1], 1 }

</bundles_post_ra>
